<compile_context>
chip_gen: v7x
topology: tpu7x:2x2x1
jax: 0.10.0
libtpu: 0.0.40
codegen_flags: <defaults>
</compile_context>

<pallas_src>
import functools

import jax
import jax.numpy as jnp
from jax import lax
from jax.experimental import pallas as pl
from jax.experimental.pallas import tpu as pltpu

_NEG = -1e30          # finite "-inf" used for masking (avoids inf-inf NaNs)
_OUT_LANES = 128      # lane-dense per-row output width (unmasked vst)


def _angular_reduce_kernel(x_ref, w_ref, lab_ref, tgt_ref, lse_ref,
                           xn_ref, m_ref, l_ref, t_ref,
                           *, s, num_classes, block_c):
    j = pl.program_id(1)                  # class-tile index (reduction axis)

    # ---- once per row block (class tile 0): normalize x, reset accumulators.
    @pl.when(j == 0)
    def _init():
        x = x_ref[...]                                            # (tm, F) f32
        norm = jnp.sqrt(jnp.sum(x * x, axis=1, keepdims=True))
        inv = pl.reciprocal(jnp.maximum(norm, 1e-12))             # EUP, exact
        xn_ref[...] = (x * inv).astype(xn_ref.dtype)
        m_ref[...] = jnp.full_like(m_ref, _NEG)
        l_ref[...] = jnp.zeros_like(l_ref)
        t_ref[...] = jnp.zeros_like(t_ref)

    # ---- every (row, class) tile: streamed logits on the MXU.
    # Contract last dims of both operands -> W consumed in its native (C, F)
    # layout, no transpose materialization.
    wf = lax.dot_general(xn_ref[...], w_ref[...],
                         dimension_numbers=(((1,), (1,)), ((), ())),
                         preferred_element_type=jnp.float32)      # (tm, tn) f32

    labels = lab_ref[...]                                         # (tm, 1) i32
    col = j * block_c + lax.broadcasted_iota(jnp.int32, wf.shape, 1)
    is_target = col == labels
    in_range = col < num_classes                                  # mask C-padding

    # target logit wf[i, y_i]  (exactly one class tile contributes per row)
    t_ref[...] += jnp.sum(jnp.where(is_target, wf, 0.0), axis=1, keepdims=True)

    # online log-sum-exp over the *excluded* (non-target, non-padded) columns
    scores = jnp.where(in_range & jnp.logical_not(is_target), s * wf, _NEG)
    m_prev = m_ref[...]
    m_new = jnp.maximum(m_prev, jnp.max(scores, axis=1, keepdims=True))
    l_ref[...] = (jnp.exp(m_prev - m_new) * l_ref[...]
                  + jnp.sum(jnp.exp(scores - m_new), axis=1, keepdims=True))
    m_ref[...] = m_new

    # ---- finalize on the last class tile: lane-dense per-row outputs.
    @pl.when(j == pl.num_programs(1) - 1)
    def _finalize():
        l_run = l_ref[...]
        lse = jnp.where(l_run > 0.0, m_ref[...] + jnp.log(l_run), _NEG)
        tgt_ref[...] = jnp.broadcast_to(t_ref[...], tgt_ref.shape)
        lse_ref[...] = jnp.broadcast_to(lse, lse_ref.shape)


def _round_up(v, d):
    return (v + d - 1) // d * d


def angular_penalty_sm_loss(x, weight, labels, *, loss_type="arcface", eps=1e-7,
                            s=None, m=None, block_n=128, block_c=512,
                            mxu_dtype=jnp.bfloat16):
    """x: (N, in_features), weight: (out_features, in_features) [nn.Linear layout],
    labels: (N,) int.  Returns scalar f32 loss."""
    loss_type = loss_type.lower()
    assert loss_type in ("arcface", "sphereface", "cosface")
    if s is None:
        s = 30.0 if loss_type == "cosface" else 64.0
    if m is None:
        m = {"arcface": 0.5, "sphereface": 1.35, "cosface": 0.4}[loss_type]
    s, m, eps = float(s), float(m), float(eps)

    n, f = x.shape
    c, f2 = weight.shape
    assert f == f2 and labels.shape == (n,)

    tm = block_n                                   # >=128: MXU-friendly row tile
    tn = min(block_c, _round_up(c, 128))           # class tile, 128-lane aligned
    n_pad = _round_up(n, tm)
    c_pad = _round_up(c, tn)

    x_p = jnp.pad(x.astype(jnp.float32), ((0, n_pad - n), (0, 0)))
    w_p = jnp.pad(weight.astype(mxu_dtype), ((0, c_pad - c), (0, 0)))
    lab_p = jnp.pad(labels.astype(jnp.int32), (0, n_pad - n)).reshape(n_pad, 1)

    kernel = functools.partial(_angular_reduce_kernel, s=s, num_classes=c,
                               block_c=tn)

    out_t, out_lse = pl.pallas_call(
        kernel,
        out_shape=(jax.ShapeDtypeStruct((n_pad, _OUT_LANES), jnp.float32),
                   jax.ShapeDtypeStruct((n_pad, _OUT_LANES), jnp.float32)),
        grid_spec=pltpu.PrefetchScalarGridSpec(
            num_scalar_prefetch=0,
            grid=(n_pad // tm, c_pad // tn),        # rows, classes (reduction last)
            in_specs=[
                pl.BlockSpec((tm, f), lambda i, j: (i, 0)),   # x row block (resident)
                pl.BlockSpec((tn, f), lambda i, j: (j, 0)),   # W class tile (streamed)
                pl.BlockSpec((tm, 1), lambda i, j: (i, 0)),   # labels row block
            ],
            out_specs=[pl.BlockSpec((tm, _OUT_LANES), lambda i, j: (i, 0)),
                       pl.BlockSpec((tm, _OUT_LANES), lambda i, j: (i, 0))],
            scratch_shapes=[
                pltpu.VMEM((tm, f), mxu_dtype),     # normalized x, reused per class tile
                pltpu.VMEM((tm, 1), jnp.float32),   # running max of excluded s*wf
                pltpu.VMEM((tm, 1), jnp.float32),   # running sum of exp (excluded)
                pltpu.VMEM((tm, 1), jnp.float32),   # target logit wf[i, y_i]
            ]),
        compiler_params=pltpu.CompilerParams(
            dimension_semantics=("parallel", "arbitrary")),
    )(x_p, w_p, lab_p)

    # ---- tiny per-row epilogue (N scalars) in plain JAX: loss-type numerator,
    # stabilized log-denominator, mean.
    t = out_t[:n, 0]
    lse = out_lse[:n, 0]
    if loss_type == "arcface":
        numerator = s * jnp.cos(jnp.arccos(jnp.clip(t, -1.0 + eps, 1.0 - eps)) + m)
    elif loss_type == "sphereface":
        numerator = s * jnp.cos(m * jnp.arccos(jnp.clip(t, -1.0 + eps, 1.0 - eps)))
    else:  # cosface
        numerator = s * (t - m)
    log_denom = jnp.logaddexp(numerator, lse)
    return -jnp.mean(numerator - log_denom)


def _reference(x, weight, labels, *, loss_type="arcface", eps=1e-7, s=None, m=None):
    # Pure-JAX reference mirroring the PyTorch forward.
    if s is None:
        s = 30.0 if loss_type == "cosface" else 64.0
    if m is None:
        m = {"arcface": 0.5, "sphereface": 1.35, "cosface": 0.4}[loss_type]
    xn = x / jnp.maximum(jnp.linalg.norm(x, axis=1, keepdims=True), 1e-12)
    wf = jnp.matmul(xn, weight.T, precision=lax.Precision.HIGHEST)
    tgt = wf[jnp.arange(x.shape[0]), labels]
    if loss_type == "arcface":
        numerator = s * jnp.cos(jnp.arccos(jnp.clip(tgt, -1.0 + eps, 1.0 - eps)) + m)
    elif loss_type == "sphereface":
        numerator = s * jnp.cos(m * jnp.arccos(jnp.clip(tgt, -1.0 + eps, 1.0 - eps)))
    elif loss_type == "cosface":
        numerator = s * (tgt - m)
    else:
        raise NotImplementedError(loss_type)
    mask = jax.nn.one_hot(labels, weight.shape[0], dtype=bool)
    denom = jnp.exp(numerator) + jnp.sum(jnp.where(mask, 0.0, jnp.exp(s * wf)), axis=1)
    L = numerator - jnp.log(denom)
    return -jnp.mean(L)


if __name__ == "__main__":
    key = jax.random.PRNGKey(0)

    def make_inputs(k, n, f, c):
        kx, kw, kl = jax.random.split(k, 3)
        x = jax.random.normal(kx, (n, f), dtype=jnp.float32)
        bound = 1.0 / (f ** 0.5)                  # nn.Linear default init range
        w = jax.random.uniform(kw, (c, f), minval=-bound, maxval=bound,
                               dtype=jnp.float32)
        y = jax.random.randint(kl, (n,), 0, c, dtype=jnp.int32)
        return x, w, y

    k1, k2 = jax.random.split(key)

    # --- small demo shape (batch=8, in_features=32, out_features=16) ---------
    x, w, y = make_inputs(k1, 8, 32, 16)

    ref = _reference(x, w, y, loss_type="arcface")
    loss_exact = angular_penalty_sm_loss(x, w, y, loss_type="arcface",
                                         mxu_dtype=jnp.float32)
    loss_exact = jax.block_until_ready(loss_exact)
    assert jnp.allclose(loss_exact, ref, rtol=1e-3, atol=1e-3), (loss_exact, ref)

    loss_fast = angular_penalty_sm_loss(x, w, y, loss_type="arcface")  # bf16 MXU
    loss_fast = jax.block_until_ready(loss_fast)
    assert jnp.allclose(loss_fast, ref, rtol=5e-2, atol=5e-2), (loss_fast, ref)

    ref_cos = _reference(x, w, y, loss_type="cosface")
    loss_cos = angular_penalty_sm_loss(x, w, y, loss_type="cosface",
                                       mxu_dtype=jnp.float32)
    loss_cos = jax.block_until_ready(loss_cos)
    assert jnp.allclose(loss_cos, ref_cos, rtol=1e-3, atol=1e-3), (loss_cos, ref_cos)

    ref_sph = _reference(x, w, y, loss_type="sphereface")
    loss_sph = angular_penalty_sm_loss(x, w, y, loss_type="sphereface",
                                       mxu_dtype=jnp.float32)
    loss_sph = jax.block_until_ready(loss_sph)
    assert jnp.allclose(loss_sph, ref_sph, rtol=1e-3, atol=1e-3), (loss_sph, ref_sph)

    # --- multi-tile case: exercises class streaming + row/class padding masks -
    x2, w2, y2 = make_inputs(k2, 200, 64, 300)
    ref2 = _reference(x2, w2, y2, loss_type="arcface")
    loss2 = angular_penalty_sm_loss(x2, w2, y2, loss_type="arcface",
                                    mxu_dtype=jnp.float32, block_c=128)
    loss2 = jax.block_until_ready(loss2)
    assert jnp.allclose(loss2, ref2, rtol=1e-3, atol=1e-3), (loss2, ref2)

    print("KERNEL_OK")
</pallas_src>

<mosaic_0001>
module attributes {stable_mosaic.version = 11 : i64} {
  func.func @_angular_reduce_kernel(%arg0: i32, %arg1: i32, %arg2: memref<128x32xf32, #tpu.memory_space<vmem>>, %arg3: memref<128x32xf32, #tpu.memory_space<vmem>>, %arg4: memref<128x1xi32, #tpu.memory_space<vmem>>, %arg5: memref<128x128xf32, #tpu.memory_space<vmem>>, %arg6: memref<128x128xf32, #tpu.memory_space<vmem>>, %arg7: memref<128x32xf32, #tpu.memory_space<vmem>>, %arg8: memref<128x1xf32, #tpu.memory_space<vmem>>, %arg9: memref<128x1xf32, #tpu.memory_space<vmem>>, %arg10: memref<128x1xf32, #tpu.memory_space<vmem>>) attributes {dimension_semantics = [#tpu.dimension_semantics<parallel>, #tpu.dimension_semantics<arbitrary>], iteration_bounds = array<i64: 1, 1>, scalar_prefetch = 0 : i64, scratch_operands = 4 : i64, tpu.core_type = #tpu.core_type<tc>, window_params = [{transform_indices = @transform_0, window_bounds = array<i64: 128, 32>}, {transform_indices = @transform_1, window_bounds = array<i64: 128, 32>}, {transform_indices = @transform_2, window_bounds = array<i64: 128, 1>}, {transform_indices = @transform_3, window_bounds = array<i64: 128, 128>}, {transform_indices = @transform_4, window_bounds = array<i64: 128, 128>}]} {
    %c0_i32 = arith.constant 0 : i32
    %0 = arith.cmpi eq, %arg1, %c0_i32 : i32
    %1 = arith.extui %0 : i1 to i32
    %c0_i32_0 = arith.constant 0 : i32
    %2 = arith.cmpi ne, %1, %c0_i32_0 : i32
    scf.if %2 {
      %c0_27 = arith.constant 0 : index
      %c0_28 = arith.constant 0 : index
      %47 = vector.load %arg2[%c0_27, %c0_28] : memref<128x32xf32, #tpu.memory_space<vmem>>, vector<128x32xf32>
      %48 = arith.mulf %47, %47 : vector<128x32xf32>
      %cst_29 = arith.constant dense<0.000000e+00> : vector<128xf32>
      %49 = vector.multi_reduction <add>, %48, %cst_29 [1] : vector<128x32xf32> to vector<128xf32>
      %50 = vector.shape_cast %49 : vector<128xf32> to vector<128x1xf32>
      %51 = math.sqrt %50 : vector<128x1xf32>
      %cst_30 = arith.constant 9.99999996E-13 : f32
      %52 = vector.broadcast %cst_30 : f32 to vector<128x1xf32>
      %53 = arith.maximumf %51, %52 : vector<128x1xf32>
      %54 = tpu.reciprocal %53 : vector<128x1xf32> -> vector<128x1xf32>
      %55 = vector.broadcast %54 : vector<128x1xf32> to vector<128x32xf32>
      %56 = arith.mulf %47, %55 : vector<128x32xf32>
      %c0_31 = arith.constant 0 : index
      %c0_32 = arith.constant 0 : index
      %57 = vector.load %arg7[%c0_31, %c0_32] : memref<128x32xf32, #tpu.memory_space<vmem>>, vector<128x32xf32>
      tpu.vector_store %arg7[%c0_31, %c0_32], %56 {strides = array<i32>} : memref<128x32xf32, #tpu.memory_space<vmem>>, vector<128x32xf32>,
      %cst_33 = arith.constant -1.000000e+30 : f32
      %58 = vector.broadcast %cst_33 : f32 to vector<128x1xf32>
      %c0_34 = arith.constant 0 : index
      %c0_35 = arith.constant 0 : index
      %59 = vector.load %arg8[%c0_34, %c0_35] : memref<128x1xf32, #tpu.memory_space<vmem>>, vector<128x1xf32>
      tpu.vector_store %arg8[%c0_34, %c0_35], %58 {strides = array<i32>} : memref<128x1xf32, #tpu.memory_space<vmem>>, vector<128x1xf32>,
      %cst_36 = arith.constant 0.000000e+00 : f32
      %60 = vector.broadcast %cst_36 : f32 to vector<128x1xf32>
      %c0_37 = arith.constant 0 : index
      %c0_38 = arith.constant 0 : index
      %61 = vector.load %arg9[%c0_37, %c0_38] : memref<128x1xf32, #tpu.memory_space<vmem>>, vector<128x1xf32>
      tpu.vector_store %arg9[%c0_37, %c0_38], %60 {strides = array<i32>} : memref<128x1xf32, #tpu.memory_space<vmem>>, vector<128x1xf32>,
      %cst_39 = arith.constant 0.000000e+00 : f32
      %62 = vector.broadcast %cst_39 : f32 to vector<128x1xf32>
      %c0_40 = arith.constant 0 : index
      %c0_41 = arith.constant 0 : index
      %63 = vector.load %arg10[%c0_40, %c0_41] : memref<128x1xf32, #tpu.memory_space<vmem>>, vector<128x1xf32>
      tpu.vector_store %arg10[%c0_40, %c0_41], %62 {strides = array<i32>} : memref<128x1xf32, #tpu.memory_space<vmem>>, vector<128x1xf32>,
    } else {
    }
    %c0 = arith.constant 0 : index
    %c0_1 = arith.constant 0 : index
    %3 = vector.load %arg7[%c0, %c0_1] : memref<128x32xf32, #tpu.memory_space<vmem>>, vector<128x32xf32>
    %c0_2 = arith.constant 0 : index
    %c0_3 = arith.constant 0 : index
    %4 = vector.load %arg3[%c0_2, %c0_3] : memref<128x32xf32, #tpu.memory_space<vmem>>, vector<128x32xf32>
    %cst = arith.constant dense<0.000000e+00> : vector<128x128xf32>
    %5 = tpu.matmul %3, %4, %cst {dimension_numbers = #tpu.dot_dimension_numbers<[1], [1], [0], [0], [0, 0, 1, 0], [], []>} : vector<128x32xf32>, vector<128x32xf32>, vector<128x128xf32> -> vector<128x128xf32>
    %c0_4 = arith.constant 0 : index
    %c0_5 = arith.constant 0 : index
    %6 = vector.load %arg4[%c0_4, %c0_5] : memref<128x1xi32, #tpu.memory_space<vmem>>, vector<128x1xi32>
    %c128_i32 = arith.constant 128 : i32
    %7 = arith.muli %arg1, %c128_i32 : i32
    %8 = tpu.iota {dimensions = array<i32: 1>} : vector<128x128xi32>
    %9 = vector.broadcast %7 : i32 to vector<128x128xi32>
    %10 = arith.addi %9, %8 : vector<128x128xi32>
    %11 = vector.broadcast %6 : vector<128x1xi32> to vector<128x128xi32>
    %12 = arith.cmpi eq, %10, %11 : vector<128x128xi32>
    %c16_i32 = arith.constant 16 : i32
    %13 = vector.broadcast %c16_i32 : i32 to vector<128x128xi32>
    %14 = arith.cmpi slt, %10, %13 : vector<128x128xi32>
    %c0_6 = arith.constant 0 : index
    %c0_7 = arith.constant 0 : index
    %15 = vector.load %arg10[%c0_6, %c0_7] : memref<128x1xf32, #tpu.memory_space<vmem>>, vector<128x1xf32>
    %cst_8 = arith.constant 0.000000e+00 : f32
    %16 = vector.broadcast %cst_8 : f32 to vector<128x128xf32>
    %17 = arith.select %12, %5, %16 : vector<128x128xi1>, vector<128x128xf32>
    %cst_9 = arith.constant dense<0.000000e+00> : vector<128xf32>
    %18 = vector.multi_reduction <add>, %17, %cst_9 [1] : vector<128x128xf32> to vector<128xf32>
    %19 = vector.shape_cast %18 : vector<128xf32> to vector<128x1xf32>
    %20 = arith.addf %15, %19 : vector<128x1xf32>
    %c0_10 = arith.constant 0 : index
    %c0_11 = arith.constant 0 : index
    %21 = vector.load %arg10[%c0_10, %c0_11] : memref<128x1xf32, #tpu.memory_space<vmem>>, vector<128x1xf32>
    tpu.vector_store %arg10[%c0_10, %c0_11], %20 {strides = array<i32>} : memref<128x1xf32, #tpu.memory_space<vmem>>, vector<128x1xf32>,
    %cst_12 = arith.constant dense<true> : vector<128x128xi1>
    %22 = arith.xori %12, %cst_12 : vector<128x128xi1>
    %23 = arith.andi %14, %22 : vector<128x128xi1>
    %cst_13 = arith.constant 6.400000e+01 : f32
    %24 = vector.broadcast %cst_13 : f32 to vector<128x128xf32>
    %25 = arith.mulf %24, %5 : vector<128x128xf32>
    %cst_14 = arith.constant -1.000000e+30 : f32
    %26 = vector.broadcast %cst_14 : f32 to vector<128x128xf32>
    %27 = arith.select %23, %25, %26 : vector<128x128xi1>, vector<128x128xf32>
    %c0_15 = arith.constant 0 : index
    %c0_16 = arith.constant 0 : index
    %28 = vector.load %arg8[%c0_15, %c0_16] : memref<128x1xf32, #tpu.memory_space<vmem>>, vector<128x1xf32>
    %cst_17 = arith.constant dense<0xFF800000> : vector<128xf32>
    %29 = vector.multi_reduction <maximumf>, %27, %cst_17 [1] : vector<128x128xf32> to vector<128xf32>
    %30 = vector.shape_cast %29 : vector<128xf32> to vector<128x1xf32>
    %31 = arith.maximumf %28, %30 : vector<128x1xf32>
    %32 = arith.subf %28, %31 : vector<128x1xf32>
    %33 = math.exp %32 : vector<128x1xf32>
    %c0_18 = arith.constant 0 : index
    %c0_19 = arith.constant 0 : index
    %34 = vector.load %arg9[%c0_18, %c0_19] : memref<128x1xf32, #tpu.memory_space<vmem>>, vector<128x1xf32>
    %35 = arith.mulf %33, %34 : vector<128x1xf32>
    %36 = vector.broadcast %31 : vector<128x1xf32> to vector<128x128xf32>
    %37 = arith.subf %27, %36 : vector<128x128xf32>
    %38 = math.exp %37 : vector<128x128xf32>
    %cst_20 = arith.constant dense<0.000000e+00> : vector<128xf32>
    %39 = vector.multi_reduction <add>, %38, %cst_20 [1] : vector<128x128xf32> to vector<128xf32>
    %40 = vector.shape_cast %39 : vector<128xf32> to vector<128x1xf32>
    %41 = arith.addf %35, %40 : vector<128x1xf32>
    %c0_21 = arith.constant 0 : index
    %c0_22 = arith.constant 0 : index
    %42 = vector.load %arg9[%c0_21, %c0_22] : memref<128x1xf32, #tpu.memory_space<vmem>>, vector<128x1xf32>
    tpu.vector_store %arg9[%c0_21, %c0_22], %41 {strides = array<i32>} : memref<128x1xf32, #tpu.memory_space<vmem>>, vector<128x1xf32>,
    %c0_23 = arith.constant 0 : index
    %c0_24 = arith.constant 0 : index
    %43 = vector.load %arg8[%c0_23, %c0_24] : memref<128x1xf32, #tpu.memory_space<vmem>>, vector<128x1xf32>
    tpu.vector_store %arg8[%c0_23, %c0_24], %31 {strides = array<i32>} : memref<128x1xf32, #tpu.memory_space<vmem>>, vector<128x1xf32>,
    %c0_i32_25 = arith.constant 0 : i32
    %44 = arith.cmpi eq, %arg1, %c0_i32_25 : i32
    %45 = arith.extui %44 : i1 to i32
    %c0_i32_26 = arith.constant 0 : i32
    %46 = arith.cmpi ne, %45, %c0_i32_26 : i32
    scf.if %46 {
      %c0_27 = arith.constant 0 : index
      %c0_28 = arith.constant 0 : index
      %47 = vector.load %arg9[%c0_27, %c0_28] : memref<128x1xf32, #tpu.memory_space<vmem>>, vector<128x1xf32>
      %cst_29 = arith.constant 0.000000e+00 : f32
      %48 = vector.broadcast %cst_29 : f32 to vector<128x1xf32>
      %49 = arith.cmpf ogt, %47, %48 : vector<128x1xf32>
      %c0_30 = arith.constant 0 : index
      %c0_31 = arith.constant 0 : index
      %50 = vector.load %arg8[%c0_30, %c0_31] : memref<128x1xf32, #tpu.memory_space<vmem>>, vector<128x1xf32>
      %51 = math.log %47 : vector<128x1xf32>
      %52 = arith.addf %50, %51 : vector<128x1xf32>
      %cst_32 = arith.constant -1.000000e+30 : f32
      %53 = vector.broadcast %cst_32 : f32 to vector<128x1xf32>
      %54 = arith.select %49, %52, %53 : vector<128x1xi1>, vector<128x1xf32>
      %c0_33 = arith.constant 0 : index
      %c0_34 = arith.constant 0 : index
      %55 = vector.load %arg10[%c0_33, %c0_34] : memref<128x1xf32, #tpu.memory_space<vmem>>, vector<128x1xf32>
      %56 = vector.shape_cast %55 : vector<128x1xf32> to vector<128x1xf32>
      %57 = vector.broadcast %56 : vector<128x1xf32> to vector<128x128xf32>
      %c0_35 = arith.constant 0 : index
      %c0_36 = arith.constant 0 : index
      %58 = vector.load %arg5[%c0_35, %c0_36] : memref<128x128xf32, #tpu.memory_space<vmem>>, vector<128x128xf32>
      tpu.vector_store %arg5[%c0_35, %c0_36], %57 {strides = array<i32>} : memref<128x128xf32, #tpu.memory_space<vmem>>, vector<128x128xf32>,
      %59 = vector.shape_cast %54 : vector<128x1xf32> to vector<128x1xf32>
      %60 = vector.broadcast %59 : vector<128x1xf32> to vector<128x128xf32>
      %c0_37 = arith.constant 0 : index
      %c0_38 = arith.constant 0 : index
      %61 = vector.load %arg6[%c0_37, %c0_38] : memref<128x128xf32, #tpu.memory_space<vmem>>, vector<128x128xf32>
      tpu.vector_store %arg6[%c0_37, %c0_38], %60 {strides = array<i32>} : memref<128x128xf32, #tpu.memory_space<vmem>>, vector<128x128xf32>,
    } else {
    }
    return
  }
  func.func @transform_0(%arg0: i32, %arg1: i32) -> (i32, i32) {
    %c0_i32 = arith.constant 0 : i32
    %c0_i32_0 = arith.constant 0 : i32
    return %arg0, %c0_i32 : i32, i32
  }
  func.func @transform_1(%arg0: i32, %arg1: i32) -> (i32, i32) {
    %c0_i32 = arith.constant 0 : i32
    %c0_i32_0 = arith.constant 0 : i32
    return %arg1, %c0_i32 : i32, i32
  }
  func.func @transform_2(%arg0: i32, %arg1: i32) -> (i32, i32) {
    %c0_i32 = arith.constant 0 : i32
    %c0_i32_0 = arith.constant 0 : i32
    return %arg0, %c0_i32 : i32, i32
  }
  func.func @transform_3(%arg0: i32, %arg1: i32) -> (i32, i32) {
    %c0_i32 = arith.constant 0 : i32
    %c0_i32_0 = arith.constant 0 : i32
    return %arg0, %c0_i32 : i32, i32
  }
  func.func @transform_4(%arg0: i32, %arg1: i32) -> (i32, i32) {
    %c0_i32 = arith.constant 0 : i32
    %c0_i32_0 = arith.constant 0 : i32
    return %arg0, %c0_i32 : i32, i32
  }
}

</mosaic_0001>

<bundles_post_ra>
// kernel: tpu_custom_call.1
= control target key start
LH: loop header
LB: loop body
LE: loop exit
PB: predicated region body
PF: predicated region fallthrough
CT: control target
= control target key end

     0   :  { %10 = vsyncpa [#allocation7], 0  ;;  %vm54_vm0 = vcmask 261120   ;;  %s3093_s0 = inlined_call_operand.vmem [shape: f32[128,32], index: 0, kind: input, shape index: {}]   ;;  %s3094_s1 = inlined_call_operand.vmem [shape: f32[128,32], index: 1, kind: input, shape index: {}]   ;;  %s3095_s2 = inlined_call_operand.vmem [shape: s32[128,1], index: 2, kind: input, shape index: {}]   ;;  %s3096_s3 = inlined_call_operand.hbm [shape: f32[128,128], index: 3, kind: output, shape index: {0}]   ;;  %s3097_s4 = inlined_call_operand.hbm [shape: f32[128,128], index: 4, kind: output, shape index: {1}]  }
   0x1   :  { %v1994_v0 = vld [vmem:[%s3093_s0 + $0x8] sm:$0xff]  ;;  %v1999_v1 = vld [vmem:[%s3093_s0] sm:$0xff]  ;;  %v2022_v8 = vld [vmem:[%s3093_s0 + $0x50] sm:$0xff] }
   0x2   :  { %v2004_v2 = vld [vmem:[%s3093_s0 + $0x48] sm:$0xff]  ;;  %v39_v3 = vmul.f32 %v1994_v0, %v1994_v0  ;;  %v38_v4 = vmul.f32 %v1999_v1, %v1999_v1  ;;  %v2015_v6 = vld [vmem:[%s3093_s0 + $0x40] sm:$0xff]  ;;  %v2027_v9 = vld [vmem:[%s3093_s0 + $0x10] sm:$0xff]  ;;  %v48_v14 = vmul.f32 %v2022_v8, %v2022_v8 }
   0x3   :  { %v47_v5 = vmul.f32 %v2004_v2, %v2004_v2  ;;  %v46_v7 = vmul.f32 %v2015_v6, %v2015_v6  ;;  %v40_v15 = vmul.f32 %v2027_v9, %v2027_v9  ;;  %v2040_v16 = vld [vmem:[%s3093_s0 + $0x58] sm:$0xff]  ;;  %v344_v18 = vld [vmem:[%s3094_s1] sm:$0xff]  ;;  %v345_v19 = vld [vmem:[%s3094_s1 + $0x8] sm:$0xff] }
   0x4   :  { %v58_v10 = vsel %vm54_vm0, %v39_v3, 0.0  ;;  %v55_v11 = vsel %vm54_vm0, %v38_v4, 0.0  ;;  %v2045_v17 = vld [vmem:[%s3093_s0 + $0x18] sm:$0xff]  ;;  %vm2055_vm1 = vmpackc.low %vm54_vm0, %vm54_vm0  ;;  %v346_v21 = vld [vmem:[%s3094_s1 + $0x10] sm:$0xff]  ;;  %v49_v23 = vmul.f32 %v2040_v16, %v2040_v16 }
   0x5   :  { %59 = vadd.xlane.f32.xlu1 %v58_v10  ;;  %56 = vadd.xlane.f32.xlu0 %v55_v11  ;;  %v82_v12 = vsel %vm54_vm0, %v47_v5, 0.0  ;;  %v79_v13 = vsel %vm54_vm0, %v46_v7, 0.0  ;;  %v347_v22 = vld [vmem:[%s3094_s1 + $0x18] sm:$0xff] }
   0x9   :  { %83 = vadd.xlane.f32.xlu1 %v82_v12  ;;  %80 = vadd.xlane.f32.xlu0 %v79_v13 }
   0xa   :  { %11 = vsyncpa [#allocation9], 0  ;;  %v85_v24 = vsel %vm54_vm0, %v48_v14, 0.0  ;;  %v61_v25 = vsel %vm54_vm0, %v40_v15, 0.0  ;;  %v41_v26 = vmul.f32 %v2045_v17, %v2045_v17  ;;  %v1676_v27 = vpack.c.bf16 %v345_v19, %v344_v18  ;;  %v2074_v28 = vld [vmem:[%s3093_s0 + $0x60] sm:$0xff]  ;;  %v2098_v35 = vld [vmem:[%s3093_s0 + $0x68] sm:$0xff] }
   0xb   :  { %v2079_v29 = vld [vmem:[%s3093_s0 + $0x20] sm:$0xff]  ;;  %v1682_v30 = vpack.c.bf16 %v347_v22, %v346_v21  ;;  %v88_v31 = vsel %vm54_vm0, %v49_v23, 0.0  ;;  %v50_v33 = vmul.f32 %v2074_v28, %v2074_v28  ;;  %v2103_v36 = vld [vmem:[%s3093_s0 + $0x28] sm:$0xff]  ;;  %v51_v41 = vmul.f32 %v2098_v35, %v2098_v35  ;;  %v2124_v43 = vld [vmem:[%s3093_s0 + $0x70] sm:$0xff] }
   0xc   :  { %1678 = vmatprep.subr.msk.bf16.mxu0 %vm2055_vm1, %v1676_v27  ;;  %1724 = vmatprep.subr.msk.bf16.mxu1 %vm2055_vm1, %v1676_v27  ;;  %v64_v32 = vsel %vm54_vm0, %v41_v26, 0.0  ;;  %v42_v34 = vmul.f32 %v2079_v29, %v2079_v29  ;;  %v348_v37 = vld [vmem:[%s3094_s1 + $0x20] sm:$0xff]  ;;  %v349_v38 = vld [vmem:[%s3094_s1 + $0x28] sm:$0xff]  ;;  %v43_v42 = vmul.f32 %v2103_v36, %v2103_v36  ;;  %v2129_v44 = vld [vmem:[%s3093_s0 + $0x30] sm:$0xff]  ;;  %v52_v48 = vmul.f32 %v2124_v43, %v2124_v43 }
   0xd   :  { %86 = vadd.xlane.f32.xlu1 %v85_v24  ;;  %62 = vadd.xlane.f32.xlu0 %v61_v25  ;;  %v91_v39 = vsel %vm54_vm0, %v50_v33, 0.0  ;;  %v1688_v45 = vpack.c.bf16 %v349_v38, %v348_v37  ;;  %v94_v46 = vsel %vm54_vm0, %v51_v41, 0.0  ;;  %v44_v49 = vmul.f32 %v2129_v44, %v2129_v44  ;;  %v2144_v50 = vld [vmem:[%s3093_s0 + $0x78] sm:$0xff]  ;;  %v350_v52 = vld [vmem:[%s3094_s1 + $0x30] sm:$0xff]  ;;  %v352_v61 = vld [vmem:[%s3094_s1 + $0x40] sm:$0xff] }
   0xe   :  { %1681 = vmatpush3.bf16.xpose.msk.msra.mxu0 %vm2055_vm1, %v1676_v27  ;;  %1732 = vmatpush3.bf16.xpose.msk.msra.mxu1 %vm2055_vm1, %v1676_v27  ;;  %v67_v40 = vsel %vm54_vm0, %v42_v34, 0.0  ;;  %v70_v47 = vsel %vm54_vm0, %v43_v42, 0.0  ;;  %v2149_v51 = vld [vmem:[%s3093_s0 + $0x38] sm:$0xff]  ;;  %v97_v54 = vsel %vm54_vm0, %v52_v48, 0.0  ;;  %v53_v56 = vmul.f32 %v2144_v50, %v2144_v50  ;;  %v353_v62 = vld [vmem:[%s3094_s1 + $0x48] sm:$0xff]  ;;  %v354_v3 = vld [vmem:[%s3094_s1 + $0x50] sm:$0xff] }
   0xf   :  { %1684 = vmatprep.subr.msk.bf16.mxu0 %vm2055_vm1, %v1682_v30  ;;  %1725 = vmatprep.subr.msk.bf16.mxu1 %vm2055_vm1, %v1682_v30  ;;  %v351_v53 = vld [vmem:[%s3094_s1 + $0x38] sm:$0xff]  ;;  %v73_v55 = vsel %vm54_vm0, %v44_v49, 0.0  ;;  %v45_v57 = vmul.f32 %v2149_v51, %v2149_v51  ;;  %v1700_v63 = vpack.c.bf16 %v353_v62, %v352_v61  ;;  %v356_v7 = vld [vmem:[%s3094_s1 + $0x60] sm:$0xff]  ;;  %v357_v10 = vld [vmem:[%s3094_s1 + $0x68] sm:$0xff]  ;;  %v1958_v18 = vmov 0  }
  0x10   :  { %v1694_v58 = vpack.c.bf16 %v351_v53, %v350_v52  ;;  %v100_v59 = vsel %vm54_vm0, %v53_v56, 0.0  ;;  %v355_v4 = vld [vmem:[%s3094_s1 + $0x58] sm:$0xff]  ;;  %v1712_v11 = vpack.c.bf16 %v357_v10, %v356_v7  ;;  %v358_v12 = vld [vmem:[%s3094_s1 + $0x70] sm:$0xff]  ;;  %v603_v15 = vld [vmem:[%s3095_s2 + $0x8] sm:$0xff]  ;;  %1749 = vset.pattern.permute.xlu1 %v1958_v18  ;;  %1748 = vset.pattern.permute.xlu0 %v1958_v18 }
  0x11   :  { %89 = vadd.xlane.f32.xlu1 %v88_v31  ;;  %65 = vadd.xlane.f32.xlu0 %v64_v32  ;;  %v76_v60 = vsel %vm54_vm0, %v45_v57, 0.0  ;;  %v1706_v5 = vpack.c.bf16 %v355_v4, %v354_v3  ;;  %v359_v13 = vld [vmem:[%s3094_s1 + $0x78] sm:$0xff]  ;;  %v604_v19 = vld [vmem:[%s3095_s2 + $0x10] sm:$0xff]  ;;  %v606_v20 = vld [vmem:[%s3095_s2 + $0x20] sm:$0xff] }
  0x12   :  { %v1718_v14 = vpack.c.bf16 %v359_v13, %v358_v12  ;;  %v605_v21 = vld [vmem:[%s3095_s2 + $0x18] sm:$0xff]  ;;  %v602_v22 = vld [vmem:[%s3095_s2] sm:$0xff]  ;;  %v611_v23 = vld [vmem:[%s3095_s2 + $0x48] sm:$0xff] }
  0x13   :  { %v607_v24 = vld [vmem:[%s3095_s2 + $0x28] sm:$0xff]  ;;  %v613_v25 = vld [vmem:[%s3095_s2 + $0x58] sm:$0xff]  ;;  %v608_v26 = vld [vmem:[%s3095_s2 + $0x30] sm:$0xff] }
  0x14   :  { %v615_v27 = vld [vmem:[%s3095_s2 + $0x68] sm:$0xff]  ;;  %v617_v31 = vld [vmem:[%s3095_s2 + $0x78] sm:$0xff]  ;;  %v610_v32 = vld [vmem:[%s3095_s2 + $0x40] sm:$0xff] }
  0x15   :  { %92 = vadd.xlane.f32.xlu1 %v91_v39  ;;  %68 = vadd.xlane.f32.xlu0 %v67_v40  ;;  %v612_v33 = vld [vmem:[%s3095_s2 + $0x50] sm:$0xff]  ;;  %v614_v34 = vld [vmem:[%s3095_s2 + $0x60] sm:$0xff] }
  0x16   :  { %1687 = vmatpush3.bf16.xpose.msk.msra.mxu0 %vm2055_vm1, %v1682_v30  ;;  %1733 = vmatpush3.bf16.xpose.msk.msra.mxu1 %vm2055_vm1, %v1682_v30  ;;  %v609_v30 = vld [vmem:[%s3095_s2 + $0x38] sm:$0xff]  ;;  %v616_v37 = vld [vmem:[%s3095_s2 + $0x70] sm:$0xff]  ;;  %s1962_s2 = smov [#allocation6]  }
  0x17   :  { %1690 = vmatprep.subr.msk.bf16.mxu0 %vm2055_vm1, %v1688_v45  ;;  %1726 = vmatprep.subr.msk.bf16.mxu1 %vm2055_vm1, %v1688_v45  ;;  %s1529_s29 = sshll.u32 %s1962_s2, 4  ;;  %s1530_s29 = int_to_ptr.vmem [resolvable:$true] %s1529_s29 }
  0x18   :  { %s1910_s30 = scalar_lea.vmem %s1530_s29, 2048  ;;  %p1915_p1 = scmp.lt.s32.totalorder %s1530_s29, %s1530_s29 }
  0x19   :  { %95 = vadd.xlane.f32.xlu1 %v94_v46  ;;  %71 = vadd.xlane.f32.xlu0 %v70_v47  ;;  %p1911_p0 = scmp.ne.s32.totalorder %s1530_s29, %s1910_s30  ;;  %p1916_p2 = scmp.lt.s32.totalorder %s1910_s30, %s1910_s30 }
  0x1b   :  { %p1917_p3 = por %p1916_p2, %p1915_p1 }
  0x1d   :  { %98 = vadd.xlane.f32.xlu1 %v97_v54  ;;  %74 = vadd.xlane.f32.xlu0 %v73_v55  ;;  %p1918_p4 = pnand %p1917_p3, %p1911_p0 }
  0x1e   :  { %1693 = vmatpush3.bf16.xpose.msk.msra.mxu0 %vm2055_vm1, %v1688_v45  ;;  %1734 = vmatpush3.bf16.xpose.msk.msra.mxu1 %vm2055_vm1, %v1688_v45 }
  0x1f   :  { %1696 = vmatprep.subr.msk.bf16.mxu0 %vm2055_vm1, %v1694_v58  ;;  %1727 = vmatprep.subr.msk.bf16.mxu1 %vm2055_vm1, %v1694_v58 }
  0x21   :  { %101 = vadd.xlane.f32.xlu1 %v100_v59  ;;  %77 = vadd.xlane.f32.xlu0 %v76_v60 }
  0x26   :  { %1699 = vmatpush3.bf16.xpose.msk.msra.mxu0 %vm2055_vm1, %v1694_v58  ;;  %1735 = vmatpush3.bf16.xpose.msk.msra.mxu1 %vm2055_vm1, %v1694_v58 }
  0x27   :  { %1702 = vmatprep.subr.msk.bf16.mxu0 %vm2055_vm1, %v1700_v63  ;;  %1728 = vmatprep.subr.msk.bf16.mxu1 %vm2055_vm1, %v1700_v63 }
  0x2e   :  { %1705 = vmatpush3.bf16.xpose.msk.msra.mxu0 %vm2055_vm1, %v1700_v63  ;;  %1736 = vmatpush3.bf16.xpose.msk.msra.mxu1 %vm2055_vm1, %v1700_v63 }
  0x2f   :  { %1708 = vmatprep.subr.msk.bf16.mxu0 %vm2055_vm1, %v1706_v5  ;;  %1729 = vmatprep.subr.msk.bf16.mxu1 %vm2055_vm1, %v1706_v5 }
  0x32   :  { %627 = vperm.xlu1 %1749, %v603_v15  }
  0x36   :  { %1711 = vmatpush3.bf16.xpose.msk.msra.mxu0 %vm2055_vm1, %v1706_v5  ;;  %1737 = vmatpush3.bf16.xpose.msk.msra.mxu1 %vm2055_vm1, %v1706_v5 }
  0x37   :  { %1714 = vmatprep.subr.msk.bf16.mxu0 %vm2055_vm1, %v1712_v11  ;;  %1730 = vmatprep.subr.msk.bf16.mxu1 %vm2055_vm1, %v1712_v11 }
  0x38   :  { %630 = vperm.xlu1 %1749, %v604_v19   ;;  %624 = vperm.xlu0 %1748, %v602_v22  }
  0x3c   :  { %633 = vperm.xlu1 %1749, %v605_v21   ;;  %651 = vperm.xlu0 %1748, %v611_v23  }
  0x3e   :  { %1717 = vmatpush3.bf16.xpose.msk.msra.mxu0 %vm2055_vm1, %v1712_v11  ;;  %1738 = vmatpush3.bf16.xpose.msk.msra.mxu1 %vm2055_vm1, %v1712_v11 }
  0x3f   :  { %1720 = vmatprep.subr.msk.bf16.mxu0 %vm2055_vm1, %v1718_v14  ;;  %1731 = vmatprep.subr.msk.bf16.mxu1 %vm2055_vm1, %v1718_v14 }
  0x40   :  { %636 = vperm.xlu1 %1749, %v606_v20   ;;  %657 = vperm.xlu0 %1748, %v613_v25  }
  0x44   :  { %639 = vperm.xlu1 %1749, %v607_v24   ;;  %663 = vperm.xlu0 %1748, %v615_v27  }
  0x46   :  { %1723 = vmatpush3.bf16.xpose.msk.msra.mxu0 %vm2055_vm1, %v1718_v14  ;;  %1739 = vmatpush3.bf16.xpose.msk.msra.mxu1 %vm2055_vm1, %v1718_v14 }
  0x48   :  { %642 = vperm.xlu1 %1749, %v608_v26   ;;  %669 = vperm.xlu0 %1748, %v617_v31  }
  0x4c   :  { %645 = vperm.xlu1 %1749, %v609_v30  }
  0x50   :  { %648 = vperm.xlu1 %1749, %v610_v32  }
  0x54   :  { %654 = vperm.xlu1 %1749, %v612_v33  }
  0x58   :  { %660 = vperm.xlu1 %1749, %v614_v34  }
  0x5c   :  { %666 = vperm.xlu1 %1749, %v616_v37  }
  0x92   :  { %v60_v38 = vpop.xlane.xlu1 %59  ;;  %v57_v39 = vpop.xlane.xlu0 %56 }
  0x93   :  { %1750 = vrsqrt.f32 %v60_v38  ;;  %vm112_vm2 = vcmp.eq.f32.partialorder %v60_v38, inf  ;;  %vm114_vm3 = vcmp.eq.f32.partialorder %v60_v38, 0.0  ;;  %v115_v47 = vand.u32 2147483648, %v60_v38 }
  0x94   :  { %1752 = vrsqrt.f32 %v57_v39  ;;  %vm105_vm4 = vcmp.eq.f32.partialorder %v57_v39, inf  ;;  %vm107_vm5 = vcmp.eq.f32.partialorder %v57_v39, 0.0  ;;  %v108_v52 = vand.u32 2147483648, %v57_v39 }
  0x96   :  { %v84_v40 = vpop.xlane.xlu1 %83  ;;  %v81_v41 = vpop.xlane.xlu0 %80 }
  0x97   :  { %1754 = vrsqrt.f32 %v84_v40  ;;  %vm168_vm6 = vcmp.eq.f32.partialorder %v84_v40, inf  ;;  %vm170_vm7 = vcmp.eq.f32.partialorder %v84_v40, 0.0  ;;  %v171_v56 = vand.u32 2147483648, %v84_v40 }
  0x98   :  { %1756 = vrsqrt.f32 %v81_v41  ;;  %vm161_vm8 = vcmp.eq.f32.partialorder %v81_v41, inf  ;;  %vm163_vm9 = vcmp.eq.f32.partialorder %v81_v41, 0.0  ;;  %v164_v61 = vand.u32 2147483648, %v81_v41 }
  0x9a   :  { %v2285_v42 = vpop.xlane.xlu1 %86  ;;  %v2287_v45 = vpop.xlane.xlu0 %62 }
  0x9b   :  { %1758 = vrsqrt.f32 %v2285_v42  ;;  %vm175_vm10 = vcmp.eq.f32.partialorder %v2285_v42, inf  ;;  %vm177_vm11 = vcmp.eq.f32.partialorder %v2285_v42, 0.0  ;;  %v178_v12 = vand.u32 2147483648, %v2285_v42 }
  0x9c   :  { %1760 = vrsqrt.f32 %v2287_v45  ;;  %vm119_vm12 = vcmp.eq.f32.partialorder %v2287_v45, inf  ;;  %vm121_vm13 = vcmp.eq.f32.partialorder %v2287_v45, 0.0  ;;  %v122_v19 = vand.u32 2147483648, %v2287_v45 }
  0x9d   :  { %v1751_v46 = vpop.eup %1750 }
  0x9e   :  { %v1753_v48 = vpop.eup %1752  ;;  %v111_v49 = vmul.f32 %v1751_v46, %v60_v38  ;;  %v2291_v53 = vpop.xlane.xlu1 %89 }
  0x9f   :  { %v2293_v54 = vpop.xlane.xlu0 %65  ;;  %v104_v55 = vmul.f32 %v1753_v48, %v57_v39  ;;  %1762 = vrsqrt.f32 %v2291_v53  ;;  %vm182_vm14 = vcmp.eq.f32.partialorder %v2291_v53, inf  ;;  %vm184_vm15 = vcmp.eq.f32.partialorder %v2291_v53, 0.0 }
  0xa0   :  { %v113_v57 = vsel %vm112_vm2, %v60_v38, %v111_v49  ;;  %1764 = vrsqrt.f32 %v2293_v54  ;;  %v185_v31 = vand.u32 2147483648, %v2291_v53  ;;  %vm126_vm1 = vcmp.eq.f32.partialorder %v2293_v54, inf }
  0xa1   :  { %v1755_v58 = vpop.eup %1754  ;;  %v116_v59 = vsel %vm114_vm3, %v115_v47, %v113_v57  ;;  %v106_v60 = vsel %vm105_vm4, %v57_v39, %v104_v55  ;;  %vm128_vm2 = vcmp.eq.f32.partialorder %v2293_v54, 0.0  ;;  %v129_v47 = vand.u32 2147483648, %v2293_v54 }
  0xa2   :  { %v1757_v62 = vpop.eup %1756  ;;  %v216_v63 = vmax.f32 %v116_v59, 1e-12  ;;  %v109_v3 = vsel %vm107_vm5, %v108_v52, %v106_v60  ;;  %v167_v4 = vmul.f32 %v1755_v58, %v84_v40  ;;  %v2302_v5 = vpop.xlane.xlu1 %92 }
  0xa3   :  { %v2304_v7 = vpop.xlane.xlu0 %68  ;;  %v215_v10 = vmax.f32 %v109_v3, 1e-12  ;;  %v160_v11 = vmul.f32 %v1757_v62, %v81_v41  ;;  %1766 = vrsqrt.f32 %v2302_v5  ;;  %vm189_vm3 = vcmp.eq.f32.partialorder %v2302_v5, inf }
  0xa4   :  { %1768 = vrcp.f32 %v216_v63  ;;  %v169_v13 = vsel %vm168_vm6, %v84_v40, %v167_v4  ;;  %vm191_vm4 = vcmp.eq.f32.partialorder %v2302_v5, 0.0  ;;  %vm133_vm5 = vcmp.eq.f32.partialorder %v2304_v7, inf }
  0xa5   :  { %v1759_v14 = vpop.eup %1758  ;;  %1770 = vrcp.f32 %v215_v10  ;;  %v172_v15 = vsel %vm170_vm7, %v171_v56, %v169_v13  ;;  %v162_v18 = vsel %vm161_vm8, %v81_v41, %v160_v11  ;;  %v192_v56 = vand.u32 2147483648, %v2302_v5 }
  0xa6   :  { %v1761_v21 = vpop.eup %1760  ;;  %v224_v20 = vmax.f32 %v172_v15, 1e-12  ;;  %v165_v22 = vsel %vm163_vm9, %v164_v61, %v162_v18  ;;  %v174_v23 = vmul.f32 %v1759_v14, %v2285_v42  ;;  %1772 = vrsqrt.f32 %v2304_v7  ;;  %v2317_v24 = vpop.xlane.xlu1 %95 }
  0xa7   :  { %v2319_v25 = vpop.xlane.xlu0 %71  ;;  %v223_v26 = vmax.f32 %v165_v22, 1e-12  ;;  %v118_v27 = vmul.f32 %v1761_v21, %v2287_v45  ;;  %vm135_vm6 = vcmp.eq.f32.partialorder %v2304_v7, 0.0  ;;  %vm196_vm7 = vcmp.eq.f32.partialorder %v2317_v24, inf }
  0xa8   :  { %1774 = vrcp.f32 %v224_v20  ;;  %v176_v30 = vsel %vm175_vm10, %v2285_v42, %v174_v23  ;;  %vm198_vm8 = vcmp.eq.f32.partialorder %v2317_v24, 0.0  ;;  %v199_v18 = vand.u32 2147483648, %v2317_v24 }
  0xa9   :  { %v1763_v32 = vpop.eup %1762  ;;  %1776 = vrcp.f32 %v223_v26  ;;  %v179_v33 = vsel %vm177_vm11, %v178_v12, %v176_v30  ;;  %v120_v34 = vsel %vm119_vm12, %v2287_v45, %v118_v27  ;;  %vm140_vm9 = vcmp.eq.f32.partialorder %v2319_v25, inf }
  0xaa   :  { %v1765_v37 = vpop.eup %1764  ;;  %v225_v38 = vmax.f32 %v179_v33, 1e-12  ;;  %v123_v39 = vsel %vm121_vm13, %v122_v19, %v120_v34  ;;  %v181_v40 = vmul.f32 %v1763_v32, %v2291_v53  ;;  %1778 = vrsqrt.f32 %v2317_v24  ;;  %v2339_v41 = vpop.xlane.xlu1 %98 }
  0xab   :  { %v217_v46 = vmax.f32 %v123_v39, 1e-12  ;;  %v125_v42 = vmul.f32 %v1765_v37, %v2293_v54  ;;  %1780 = vrsqrt.f32 %v2319_v25  ;;  %v2349_v45 = vpop.xlane.xlu0 %74  ;;  %v143_v26 = vand.u32 2147483648, %v2319_v25 }
  0xac   :  { %1782 = vrcp.f32 %v225_v38  ;;  %v183_v48 = vsel %vm182_vm14, %v2291_v53, %v181_v40  ;;  %vm142_vm10 = vcmp.eq.f32.partialorder %v2319_v25, 0.0  ;;  %vm203_vm11 = vcmp.eq.f32.partialorder %v2339_v41, inf }
  0xad   :  { %v1767_v49 = vpop.eup %1766  ;;  %1784 = vrcp.f32 %v217_v46  ;;  %v186_v52 = vsel %vm184_vm15, %v185_v31, %v183_v48  ;;  %v127_v55 = vsel %vm126_vm1, %v2293_v54, %v125_v42  ;;  %v136_v54 = vand.u32 2147483648, %v2304_v7 }
  0xae   :  { %v1769_v57 = vpop.eup %1768  ;;  %v226_v58 = vmax.f32 %v186_v52, 1e-12  ;;  %v130_v59 = vsel %vm128_vm2, %v129_v47, %v127_v55  ;;  %v188_v60 = vmul.f32 %v1767_v49, %v2302_v5  ;;  %1786 = vrsqrt.f32 %v2339_v41  ;;  %v2368_v10 = vpop.xlane.xlu1 %101 }
  0xaf   :  { %v1771_v61 = vpop.eup %1770  ;;  %v248_v62 = vmul.f32 %v1769_v57, %v1994_v0  ;;  %v218_v53 = vmax.f32 %v130_v59, 1e-12  ;;  %v2379_v13 = vpop.xlane.xlu0 %77  ;;  %v206_v38 = vand.u32 2147483648, %v2339_v41  ;;  %vm205_vm12 = vcmp.eq.f32.partialorder %v2339_v41, 0.0 }
  0xb0   :  { %v1773_v63 = vpop.eup %1772  ;;  %v247_v3 = vmul.f32 %v1771_v61, %v1999_v1  ;;  %1788 = vrcp.f32 %v226_v58  ;;  %v190_v4 = vsel %vm189_vm3, %v2302_v5, %v188_v60  ;;  %vm147_vm13 = vcmp.eq.f32.partialorder %v2349_v45, inf }
  0xb1   :  { %264 = vst.msk [vmem:[#allocation2 + $0x8] sm:$0xff] %vm54_vm0, %v248_v62  ;;  %1790 = vrcp.f32 %v218_v53  ;;  %v193_v0 = vsel %vm191_vm4, %v192_v56, %v190_v4  ;;  %v132_v11 = vmul.f32 %v1773_v63, %v2304_v7  ;;  %vm149_vm14 = vcmp.eq.f32.partialorder %v2349_v45, 0.0 }
  0xb2   :  { %v1775_v1 = vpop.eup %1774  ;;  %263 = vst.msk [vmem:[#allocation2] sm:$0xff] %vm54_vm0, %v247_v3  ;;  %v227_v12 = vmax.f32 %v193_v0, 1e-12  ;;  %1792 = vrsqrt.f32 %v2349_v45  ;;  %v150_v56 = vand.u32 2147483648, %v2349_v45  ;;  %vm210_vm15 = vcmp.eq.f32.partialorder %v2368_v10, inf }
  0xb3   :  { %v1777_v14 = vpop.eup %1776  ;;  %v256_v5 = vmul.f32 %v1775_v1, %v2004_v2  ;;  %v134_v15 = vsel %vm133_vm5, %v2304_v7, %v132_v11  ;;  %1794 = vrsqrt.f32 %v2368_v10  ;;  %v213_v60 = vand.u32 2147483648, %v2368_v10 }
  0xb4   :  { %v1779_v19 = vpop.eup %1778  ;;  %v255_v21 = vmul.f32 %v1777_v14, %v2015_v6  ;;  %1796 = vrcp.f32 %v227_v12  ;;  %v137_v20 = vsel %vm135_vm6, %v136_v54, %v134_v15  ;;  %vm212_vm1 = vcmp.eq.f32.partialorder %v2368_v10, 0.0 }
  0xb5   :  { %v1781_v22 = vpop.eup %1780  ;;  %272 = vst.msk [vmem:[#allocation2 + $0x48] sm:$0xff] %vm54_vm0, %v256_v5  ;;  %v219_v2 = vmax.f32 %v137_v20, 1e-12  ;;  %v195_v23 = vmul.f32 %v1779_v19, %v2317_v24  ;;  %1798 = vrsqrt.f32 %v2379_v13  ;;  %vm154_vm2 = vcmp.eq.f32.partialorder %v2379_v13, inf }
  0xb6   :  { %v1783_v27 = vpop.eup %1782  ;;  %271 = vst.msk [vmem:[#allocation2 + $0x40] sm:$0xff] %vm54_vm0, %v255_v21  ;;  %v139_v6 = vmul.f32 %v1781_v22, %v2319_v25  ;;  %v157_v3 = vand.u32 2147483648, %v2379_v13  ;;  %vm156_vm3 = vcmp.eq.f32.partialorder %v2379_v13, 0.0  ;;  %vm279_vm4 = vcmask 7168  }
  0xb7   :  { %v1785_v7 = vpop.eup %1784  ;;  %v257_v30 = vmul.f32 %v1783_v27, %v2022_v8  ;;  %1800 = vrcp.f32 %v219_v2  ;;  %v197_v31 = vsel %vm196_vm7, %v2317_v24, %v195_v23  ;;  %vm1960_vm7 = vmmov 1  }
  0xb8   :  { %v1787_v32 = vpop.eup %1786  ;;  %v249_v33 = vmul.f32 %v1785_v7, %v2027_v9  ;;  %v200_v34 = vsel %vm198_vm8, %v199_v18, %v197_v31  ;;  %v141_v37 = vsel %vm140_vm9, %v2319_v25, %v139_v6  ;;  %v329_v8 = vld [vmem:[#allocation2 + $0x8] sm:$0xff] }
  0xb9   :  { %273 = vst.msk [vmem:[#allocation2 + $0x50] sm:$0xff] %vm54_vm0, %v257_v30  ;;  %v228_v39 = vmax.f32 %v200_v34, 1e-12  ;;  %v144_v40 = vsel %vm142_vm10, %v143_v26, %v141_v37  ;;  %v202_v46 = vmul.f32 %v1787_v32, %v2339_v41  ;;  %v328_v42 = vld [vmem:[#allocation2] sm:$0xff]  ;;  %v1959_v37 = vmov 0.0  }
  0xba   :  { %v1789_v9 = vpop.eup %1788  ;;  %265 = vst.msk [vmem:[#allocation2 + $0x10] sm:$0xff] %vm54_vm0, %v249_v33  ;;  %v220_v24 = vmax.f32 %v144_v40, 1e-12  ;;  %1652 = vmatprep.mubr.msk.f32.mxu0 %vm54_vm0, %v328_v42  ;;  %v619_v42 = vlaneseq }
  0xbb   :  { %v1791_v25 = vpop.eup %1790  ;;  %v258_v47 = vmul.f32 %v1789_v9, %v2040_v16  ;;  %1802 = vrcp.f32 %v228_v39  ;;  %v204_v48 = vsel %vm203_vm11, %v2339_v41, %v202_v46  ;;  %1653 = vmatmul.mubr.msk.f32.vlgmr.msra.gmra.mrb[0].mxu0 %vm54_vm0, %v329_v8  ;;  %313 = vst.msk [vmem:[#allocation5 + $0x8] sm:$0xff] %vm279_vm4, %v1959_v37  ;;  %296 = vst.msk [vmem:[#allocation4] sm:$0xff] %vm279_vm4, %v1959_v37 }
  0xbc   :  { %v1793_v49 = vpop.eup %1792  ;;  %v250_v52 = vmul.f32 %v1791_v25, %v2045_v17  ;;  %1804 = vrcp.f32 %v220_v24  ;;  %v207_v55 = vsel %vm205_vm12, %v206_v38, %v204_v48  ;;  %v337_v57 = vld [vmem:[#allocation2 + $0x48] sm:$0xff]  ;;  %297 = vst.msk [vmem:[#allocation4 + $0x8] sm:$0xff] %vm279_vm4, %v1959_v37  ;;  %298 = vst.msk [vmem:[#allocation4 + $0x10] sm:$0xff] %vm279_vm4, %v1959_v37  ;;  %v2520_v9 = vand.u32 127, %v619_v42  ;;  %v625_v24 = vpop.permute.xlu0 %624 }
  0xbd   :  { %v1795_v16 = vpop.eup %1794  ;;  %274 = vst.msk [vmem:[#allocation2 + $0x58] sm:$0xff] %vm54_vm0, %v258_v47  ;;  %v229_v58 = vmax.f32 %v207_v55, 1e-12  ;;  %v146_v59 = vmul.f32 %v1793_v49, %v2349_v45  ;;  %v336_v61 = vld [vmem:[#allocation2 + $0x40] sm:$0xff] }
  0xbe   :  { %v1797_v62 = vpop.eup %1796  ;;  %266 = vst.msk [vmem:[#allocation2 + $0x18] sm:$0xff] %vm54_vm0, %v250_v52  ;;  %v209_v17 = vmul.f32 %v1795_v16, %v2368_v10  ;;  %1664 = vmatprep.mubr.msk.f32.mxu1 %vm54_vm0, %v336_v61  ;;  %vm671_vm5 = vcmp.eq.s32.totalorder %v2520_v9, %v625_v24  ;;  %vm687_vm10 = vcmp.lt.s32.totalorder %v2520_v9, 16 }
  0xbf   :  { %v1799_v41 = vpop.eup %1798  ;;  %v259_v53 = vmul.f32 %v1797_v62, %v2074_v28  ;;  %1806 = vrcp.f32 %v229_v58  ;;  %v148_v63 = vsel %vm147_vm13, %v2349_v45, %v146_v59  ;;  %1665 = vmatmul.mubr.msk.f32.vlgmr.msra.gmra.mrb[0].mxu1 %vm54_vm0, %v337_v57  ;;  %299 = vst.msk [vmem:[#allocation4 + $0x18] sm:$0xff] %vm279_vm4, %v1959_v37  ;;  %300 = vst.msk [vmem:[#allocation4 + $0x20] sm:$0xff] %vm279_vm4, %v1959_v37 }
  0xc0   :  { %v151_v4 = vsel %vm149_vm14, %v150_v56, %v148_v63  ;;  %v211_v54 = vsel %vm210_vm15, %v2368_v10, %v209_v17  ;;  %v153_v0 = vmul.f32 %v1799_v41, %v2379_v13  ;;  %v338_v28 = vld [vmem:[#allocation2 + $0x50] sm:$0xff]  ;;  %301 = vst.msk [vmem:[#allocation4 + $0x28] sm:$0xff] %vm279_vm4, %v1959_v37  ;;  %302 = vst.msk [vmem:[#allocation4 + $0x30] sm:$0xff] %vm279_vm4, %v1959_v37  ;;  %v652_v52 = vpop.permute.xlu0 %651 }
  0xc1   :  { %v1801_v11 = vpop.eup %1800  ;;  %275 = vst.msk [vmem:[#allocation2 + $0x60] sm:$0xff] %vm54_vm0, %v259_v53  ;;  %v221_v1 = vmax.f32 %v151_v4, 1e-12  ;;  %v214_v12 = vsel %vm212_vm1, %v213_v60, %v211_v54  ;;  %v330_v14 = vld [vmem:[#allocation2 + $0x10] sm:$0xff]  ;;  %1667 = vmatprep.mubr.msk.f32.mxu1 %vm54_vm0, %v338_v28  ;;  %vm680_vm6 = vcmp.eq.s32.totalorder %v2520_v9, %v652_v52  ;;  %vm785_vm8 = vmxor %vm671_vm5, %vm1960_vm7 }
  0xc2   :  { %v251_v45 = vmul.f32 %v1801_v11, %v2079_v29  ;;  %v230_v5 = vmax.f32 %v214_v12, 1e-12  ;;  %v155_v15 = vsel %vm154_vm2, %v2379_v13, %v153_v0  ;;  %1655 = vmatprep.mubr.msk.f32.mxu0 %vm54_vm0, %v330_v14  ;;  %303 = vst.msk [vmem:[#allocation4 + $0x38] sm:$0xff] %vm279_vm4, %v1959_v37  ;;  %304 = vst.msk [vmem:[#allocation4 + $0x40] sm:$0xff] %vm279_vm4, %v1959_v37 }
  0xc3   :  { %1808 = vrcp.f32 %v221_v1  ;;  %v158_v18 = vsel %vm156_vm3, %v157_v3, %v155_v15  ;;  %305 = vst.msk [vmem:[#allocation4 + $0x48] sm:$0xff] %vm279_vm4, %v1959_v37  ;;  %306 = vst.msk [vmem:[#allocation4 + $0x50] sm:$0xff] %vm279_vm4, %v1959_v37 }
  0xc4   :  { %267 = vst.msk [vmem:[#allocation2 + $0x20] sm:$0xff] %vm54_vm0, %v251_v45  ;;  %1810 = vrcp.f32 %v230_v5  ;;  %v222_v19 = vmax.f32 %v158_v18, 1e-12  ;;  %v339_v10 = vld [vmem:[#allocation2 + $0x58] sm:$0xff]  ;;  %vm801_vm11 = vmand %vm687_vm10, %vm785_vm8  ;;  %v2584_v45 = vpop.permute.xlu0 %657 }
  0xc5   :  { %v1803_v21 = vpop.eup %1802  ;;  %v331_v20 = vld [vmem:[#allocation2 + $0x18] sm:$0xff]  ;;  %1668 = vmatmul.mubr.msk.f32.gmra.mrb[2].mxu1 %vm54_vm0, %v339_v10  ;;  %307 = vst.msk [vmem:[#allocation4 + $0x58] sm:$0xff] %vm279_vm4, %v1959_v37  ;;  %308 = vst.msk [vmem:[#allocation4 + $0x60] sm:$0xff] %vm279_vm4, %v1959_v37 }
  0xc6   :  { %v1805_v22 = vpop.eup %1804  ;;  %v260_v29 = vmul.f32 %v1803_v21, %v2098_v35  ;;  %1812 = vrcp.f32 %v222_v19  ;;  %1656 = vmatmul.mubr.msk.f32.gmra.mrb[2].mxu0 %vm54_vm0, %v331_v20  ;;  %309 = vst.msk [vmem:[#allocation4 + $0x68] sm:$0xff] %vm279_vm4, %v1959_v37  ;;  %310 = vst.msk [vmem:[#allocation4 + $0x70] sm:$0xff] %vm279_vm4, %v1959_v37 }
  0xc7   :  { %v252_v13 = vmul.f32 %v1805_v22, %v2103_v36  ;;  %311 = vst.msk [vmem:[#allocation4 + $0x78] sm:$0xff] %vm279_vm4, %v1959_v37  ;;  %312 = vst.msk [vmem:[#allocation5] sm:$0xff] %vm279_vm4, %v1959_v37 }
  0xc8   :  { %276 = vst.msk [vmem:[#allocation2 + $0x68] sm:$0xff] %vm54_vm0, %v260_v29  ;;  %v340_v2 = vld [vmem:[#allocation2 + $0x60] sm:$0xff]  ;;  %vm794_vm2 = vmxor %vm680_vm6, %vm1960_vm7  ;;  %v1961_v29 = vmov -1e+30  }
  0xc9   :  { %v1807_v23 = vpop.eup %1806  ;;  %268 = vst.msk [vmem:[#allocation2 + $0x28] sm:$0xff] %vm54_vm0, %v252_v13  ;;  %1670 = vmatprep.mubr.msk.f32.mxu1 %vm54_vm0, %v340_v2 }
  0xca   :  { %v261_v26 = vmul.f32 %v1807_v23, %v2124_v43  ;;  %314 = vst.msk [vmem:[#allocation5 + $0x10] sm:$0xff] %vm279_vm4, %v1959_v37  ;;  %315 = vst.msk [vmem:[#allocation5 + $0x18] sm:$0xff] %vm279_vm4, %v1959_v37 }
  0xcb   :  { %v332_v27 = vld [vmem:[#allocation2 + $0x20] sm:$0xff]  ;;  %316 = vst.msk [vmem:[#allocation5 + $0x20] sm:$0xff] %vm279_vm4, %v1959_v37  ;;  %317 = vst.msk [vmem:[#allocation5 + $0x28] sm:$0xff] %vm279_vm4, %v1959_v37 }
  0xcc   :  { %277 = vst.msk [vmem:[#allocation2 + $0x70] sm:$0xff] %vm54_vm0, %v261_v26  ;;  %1658 = vmatprep.mubr.msk.f32.mxu0 %vm54_vm0, %v332_v27 }
  0xcd   :  { %v1809_v35 = vpop.eup %1808  ;;  %318 = vst.msk [vmem:[#allocation5 + $0x30] sm:$0xff] %vm279_vm4, %v1959_v37  ;;  %319 = vst.msk [vmem:[#allocation5 + $0x38] sm:$0xff] %vm279_vm4, %v1959_v37 }
  0xce   :  { %v1811_v6 = vpop.eup %1810  ;;  %v253_v7 = vmul.f32 %v1809_v35, %v2129_v44  ;;  %320 = vst.msk [vmem:[#allocation5 + $0x40] sm:$0xff] %vm279_vm4, %v1959_v37  ;;  %321 = vst.msk [vmem:[#allocation5 + $0x48] sm:$0xff] %vm279_vm4, %v1959_v37  ;;  %v688_v14 = vld [vmem:[#allocation5] sm:$0xff] }
  0xcf   :  { %v262_v36 = vmul.f32 %v1811_v6, %v2144_v50  ;;  %v341_v30 = vld [vmem:[#allocation2 + $0x68] sm:$0xff]  ;;  %322 = vst.msk [vmem:[#allocation5 + $0x50] sm:$0xff] %vm279_vm4, %v1959_v37  ;;  %323 = vst.msk [vmem:[#allocation5 + $0x58] sm:$0xff] %vm279_vm4, %v1959_v37 }
  0xd0   :  { %v1813_v31 = vpop.eup %1812  ;;  %269 = vst.msk [vmem:[#allocation2 + $0x30] sm:$0xff] %vm54_vm0, %v253_v7  ;;  %v333_v32 = vld [vmem:[#allocation2 + $0x28] sm:$0xff]  ;;  %1671 = vmatmul.mubr.msk.f32.gmra.mrb[4].mxu1 %vm54_vm0, %v341_v30 }
  0xd1   :  { %278 = vst.msk [vmem:[#allocation2 + $0x78] sm:$0xff] %vm54_vm0, %v262_v36  ;;  %v254_v43 = vmul.f32 %v1813_v31, %v2149_v51  ;;  %1659 = vmatmul.mubr.msk.f32.gmra.mrb[4].mxu0 %vm54_vm0, %v333_v32  ;;  %v628_v51 = vpop.permute.xlu1 %627  ;;  %v664_v32 = vpop.permute.xlu0 %663 }
  0xd2   :  { %324 = vst.msk [vmem:[#allocation5 + $0x60] sm:$0xff] %vm279_vm4, %v1959_v37  ;;  %325 = vst.msk [vmem:[#allocation5 + $0x68] sm:$0xff] %vm279_vm4, %v1959_v37 }
  0xd3   :  { %270 = vst.msk [vmem:[#allocation2 + $0x38] sm:$0xff] %vm54_vm0, %v254_v43  ;;  %v342_v33 = vld [vmem:[#allocation2 + $0x70] sm:$0xff] }
  0xd4   :  { %1673 = vmatprep.mubr.msk.f32.mxu1 %vm54_vm0, %v342_v33  ;;  %326 = vst.msk [vmem:[#allocation5 + $0x70] sm:$0xff] %vm279_vm4, %v1959_v37  ;;  %327 = vst.msk [vmem:[#allocation5 + $0x78] sm:$0xff] %vm279_vm4, %v1959_v37 }
  0xd5   :  { %v631_v38 = vpop.permute.xlu1 %630  ;;  %280 = vst.msk [vmem:[#allocation3] sm:$0xff] %vm279_vm4, %v1961_v29  ;;  %281 = vst.msk [vmem:[#allocation3 + $0x8] sm:$0xff] %vm279_vm4, %v1961_v29 }
  0xd6   :  { %vm673_vm1 = vcmp.eq.s32.totalorder %v2520_v9, %v631_v38  ;;  %282 = vst.msk [vmem:[#allocation3 + $0x10] sm:$0xff] %vm279_vm4, %v1961_v29  ;;  %283 = vst.msk [vmem:[#allocation3 + $0x18] sm:$0xff] %vm279_vm4, %v1961_v29 }
  0xd7   :  { %v334_v44 = vld [vmem:[#allocation2 + $0x30] sm:$0xff]  ;;  %vm787_vm3 = vmxor %vm673_vm1, %vm1960_vm7  ;;  %284 = vst.msk [vmem:[#allocation3 + $0x20] sm:$0xff] %vm279_vm4, %v1961_v29 }
  0xd8   :  { %1661 = vmatprep.mubr.msk.f32.mxu0 %vm54_vm0, %v334_v44  ;;  %v343_v50 = vld [vmem:[#allocation2 + $0x78] sm:$0xff]  ;;  %vm803_vm8 = vmand %vm687_vm10, %vm787_vm3  ;;  %285 = vst.msk [vmem:[#allocation3 + $0x28] sm:$0xff] %vm279_vm4, %v1961_v29 }
  0xd9   :  { %1674 = vmatmul.mubr.msk.f32.gmra.mrb[6].mxu1 %vm54_vm0, %v343_v50  ;;  %v2512_v8 = vpop.permute.xlu1 %633  ;;  %286 = vst.msk [vmem:[#allocation3 + $0x30] sm:$0xff] %vm279_vm4, %v1961_v29  ;;  %287 = vst.msk [vmem:[#allocation3 + $0x38] sm:$0xff] %vm279_vm4, %v1961_v29 }
  0xda   :  { %v335_v34 = vld [vmem:[#allocation2 + $0x38] sm:$0xff]  ;;  %288 = vst.msk [vmem:[#allocation3 + $0x40] sm:$0xff] %vm279_vm4, %v1961_v29  ;;  %289 = vst.msk [vmem:[#allocation3 + $0x48] sm:$0xff] %vm279_vm4, %v1961_v29 }
  0xdb   :  { %1662 = vmatmul.mubr.msk.f32.gmra.mrb[6].mxu0 %vm54_vm0, %v335_v34  ;;  %vm672_vm0 = vcmp.eq.s32.totalorder %v2520_v9, %v628_v51  ;;  %290 = vst.msk [vmem:[#allocation3 + $0x50] sm:$0xff] %vm279_vm4, %v1961_v29  ;;  %291 = vst.msk [vmem:[#allocation3 + $0x58] sm:$0xff] %vm279_vm4, %v1961_v29 }
  0xdc   :  { %vm786_vm12 = vmxor %vm672_vm0, %vm1960_vm7  ;;  %292 = vst.msk [vmem:[#allocation3 + $0x60] sm:$0xff] %vm279_vm4, %v1961_v29  ;;  %v2759_v19 = vld [vmem:[#allocation3 + $0x8] sm:$0xff] }
  0xdd   :  { %v2514_v39 = vpop.permute.xlu1 %636  ;;  %vm802_vm14 = vmand %vm687_vm10, %vm786_vm12  ;;  %vm682_vm12 = vcmp.eq.s32.totalorder %v2520_v9, %v2584_v45  ;;  %293 = vst.msk [vmem:[#allocation3 + $0x68] sm:$0xff] %vm279_vm4, %v1961_v29  ;;  %v2753_v45 = vld [vmem:[#allocation3] sm:$0xff] }
  0xde   :  { %294 = vst.msk [vmem:[#allocation3 + $0x70] sm:$0xff] %vm279_vm4, %v1961_v29  ;;  %295 = vst.msk [vmem:[#allocation3 + $0x78] sm:$0xff] %vm279_vm4, %v1961_v29 }
  0xe1   :  { %v2516_v40 = vpop.permute.xlu1 %639 }
  0xe5   :  { %v2518_v46 = vpop.permute.xlu1 %642 }
  0xe9   :  { %v2522_v25 = vpop.permute.xlu1 %645 }
  0xed   :  { %v649_v55 = vpop.permute.xlu1 %648 }
  0xee   :  { %vm679_vm9 = vcmp.eq.s32.totalorder %v2520_v9, %v649_v55 }
  0xef   :  { %vm793_vm13 = vmxor %vm679_vm9, %vm1960_vm7 }
  0xf0   :  { %vm809_vm15 = vmand %vm687_vm10, %vm793_vm13 }
  0xf1   :  { %v2568_v28 = vpop.permute.xlu1 %654 }
  0xf5   :  { %v2647_v27 = vpop.permute.xlu1 %660 }
 0x18e   :  { %v1654_v47 = vpop.f32.mrb[0].mxu0 }
 0x18f   :  { %v523_v48 = vpop.f32.mrb[1].mxu0  ;;  %v705_v49 = vsel %vm672_vm0, %v1654_v47, 0.0  ;;  %v818_v60 = vmul.f32 64.0, %v1654_v47  ;;  %vm810_vm0 = vmand %vm687_vm10, %vm794_vm2 }
 0x190   :  { %722 = vadd.xlane.f32.xlu0 %v705_v49  ;;  %v817_v58 = vmul.f32 64.0, %v523_v48  ;;  %v704_v61 = vsel %vm671_vm5, %v523_v48, 0.0  ;;  %vm674_vm5 = vcmp.eq.s32.totalorder %v2520_v9, %v2512_v8  ;;  %v667_v8 = vpop.permute.xlu1 %666 }
 0x191   :  { %v2556_v54 = vsel %vm802_vm14, %v818_v60, -1e+30 }
 0x192   :  { %v1666_v56 = vpop.f32.mrb[0].mxu1  ;;  %v2546_v41 = vsel %vm801_vm11, %v817_v58, -1e+30 }
 0x193   :  { %v563_v57 = vpop.f32.mrb[1].mxu1  ;;  %v713_v16 = vsel %vm680_vm6, %v1666_v56, 0.0  ;;  %v826_v4 = vmul.f32 64.0, %v1666_v56  ;;  %vm681_vm6 = vcmp.eq.s32.totalorder %v2520_v9, %v2568_v28 }
 0x194   :  { %738 = vadd.xlane.f32.xlu1 %v713_v16  ;;  %v712_v59 = vsel %vm679_vm9, %v563_v57, 0.0  ;;  %v825_v62 = vmul.f32 64.0, %v563_v57  ;;  %vm2580_vm9 = vmxor %vm674_vm5, %vm1960_vm7 }
 0x195   :  { %736 = vadd.xlane.f32.xlu0 %v712_v59  ;;  %v2570_v11 = vsel %vm810_vm0, %v826_v4, -1e+30  ;;  %vm2592_vm11 = vmxor %vm681_vm6, %vm1960_vm7  ;;  %vm676_vm0 = vcmp.eq.s32.totalorder %v2520_v9, %v2516_v40 }
 0x196   :  { %v2562_v0 = vsel %vm809_vm15, %v825_v62, -1e+30  ;;  %vm804_vm13 = vmand %vm687_vm10, %vm2580_vm9  ;;  %vm675_vm15 = vcmp.eq.s32.totalorder %v2520_v9, %v2514_v39  ;;  %v670_v39 = vpop.permute.xlu0 %669  ;;  %v689_v62 = vld [vmem:[#allocation5 + $0x8] sm:$0xff] }
 0x197   :  { %vm811_vm14 = vmand %vm687_vm10, %vm2592_vm11 }
 0x198   :  { %720 = vadd.xlane.f32.xlu1 %v704_v61  ;;  %v2544_v17 = vpop.f32.mrb[2].mxu1  ;;  %vm789_vm2 = vmxor %vm675_vm15, %vm1960_vm7 }
 0x199   :  { %v1657_v53 = vpop.f32.mrb[2].mxu0  ;;  %865 = vmax.xlane.f32.xlu0 %v2546_v41  ;;  %v2549_v63 = vpop.f32.mrb[3].mxu1  ;;  %v828_v2 = vmul.f32 64.0, %v2544_v17  ;;  %vm790_vm9 = vmxor %vm676_vm0, %vm1960_vm7  ;;  %v715_v16 = vsel %vm682_vm12, %v2544_v17, 0.0 }
 0x19a   :  { %v533_v3 = vpop.f32.mrb[3].mxu0  ;;  %v820_v5 = vmul.f32 64.0, %v1657_v53  ;;  %v707_v18 = vsel %vm674_vm5, %v1657_v53, 0.0  ;;  %v827_v10 = vmul.f32 64.0, %v2549_v63  ;;  %vm683_vm5 = vcmp.eq.s32.totalorder %v2520_v9, %v2647_v27  ;;  %v2774_v27 = vld [vmem:[#allocation3 + $0x48] sm:$0xff] }
 0x19b   :  { %v819_v1 = vmul.f32 64.0, %v533_v3  ;;  %v706_v12 = vsel %vm673_vm1, %v533_v3, 0.0  ;;  %vm796_vm1 = vmxor %vm682_vm12, %vm1960_vm7  ;;  %v714_v57 = vsel %vm681_vm6, %v2549_v63, 0.0  ;;  %v697_v63 = vld [vmem:[#allocation5 + $0x48] sm:$0xff]  ;;  %v696_v3 = vld [vmem:[#allocation5 + $0x40] sm:$0xff] }
 0x19c   :  { %867 = vmax.xlane.f32.xlu1 %v2556_v54  ;;  %v2631_v23 = vsel %vm804_vm13, %v820_v5, -1e+30  ;;  %v2638_v26 = vsel %vm811_vm14, %v827_v10, -1e+30  ;;  %vm812_vm3 = vmand %vm687_vm10, %vm796_vm1  ;;  %vm684_vm13 = vcmp.eq.s32.totalorder %v2520_v9, %v664_v32  ;;  %v2762_v10 = vld [vmem:[#allocation3 + $0x40] sm:$0xff] }
 0x19d   :  { %881 = vmax.xlane.f32.xlu0 %v2562_v0  ;;  %v2601_v22 = vsel %vm803_vm8, %v819_v1, -1e+30  ;;  %v2649_v35 = vsel %vm812_vm3, %v828_v2, -1e+30  ;;  %vm805_vm8 = vmand %vm687_vm10, %vm789_vm2  ;;  %vm677_vm2 = vcmp.eq.s32.totalorder %v2520_v9, %v2518_v46 }
 0x19e   :  { %vm797_vm11 = vmxor %vm683_vm5, %vm1960_vm7 }
 0x19f   :  { %vm806_vm14 = vmand %vm687_vm10, %vm790_vm9  ;;  %vm685_vm9 = vcmp.eq.s32.totalorder %v2520_v9, %v667_v8 }
 0x1a0   :  { %883 = vmax.xlane.f32.xlu1 %v2570_v11  ;;  %vm798_vm1 = vmxor %vm684_vm13, %vm1960_vm7 }
 0x1a1   :  { %724 = vadd.xlane.f32.xlu0 %v706_v12  ;;  %vm814_vm3 = vmand %vm687_vm10, %vm798_vm1 }
 0x1a2   :  { %vm799_vm1 = vmxor %vm685_vm9, %vm1960_vm7 }
 0x1a3   :  { %v2586_v15 = vpop.f32.mrb[4].mxu1 }
 0x1a4   :  { %v1660_v21 = vpop.f32.mrb[4].mxu0  ;;  %v2599_v20 = vpop.f32.mrb[5].mxu1  ;;  %726 = vadd.xlane.f32.xlu1 %v707_v18  ;;  %v830_v37 = vmul.f32 64.0, %v2586_v15  ;;  %v717_v59 = vsel %vm684_vm13, %v2586_v15, 0.0 }
 0x1a5   :  { %v543_v13 = vpop.f32.mrb[5].mxu0  ;;  %869 = vmax.xlane.f32.xlu0 %v2601_v22  ;;  %v822_v43 = vmul.f32 64.0, %v1660_v21  ;;  %v709_v44 = vsel %vm676_vm0, %v1660_v21, 0.0  ;;  %v829_v50 = vmul.f32 64.0, %v2599_v20  ;;  %vm791_vm0 = vmxor %vm677_vm2, %vm1960_vm7  ;;  %v716_v58 = vsel %vm683_vm5, %v2599_v20, 0.0 }
 0x1a6   :  { %v821_v6 = vmul.f32 64.0, %v543_v13  ;;  %v708_v36 = vsel %vm675_vm15, %v543_v13, 0.0  ;;  %vm813_vm15 = vmand %vm687_vm10, %vm797_vm11  ;;  %v2693_v40 = vsel %vm814_vm3, %v830_v37, -1e+30  ;;  %vm686_vm11 = vcmp.eq.s32.totalorder %v2520_v9, %v670_v39 }
 0x1a7   :  { %v2680_v51 = vsel %vm806_vm14, %v822_v43, -1e+30  ;;  %v2686_v38 = vsel %vm813_vm15, %v829_v50, -1e+30  ;;  %vm807_vm14 = vmand %vm687_vm10, %vm791_vm0  ;;  %v2794_v50 = vld [vmem:[#allocation3 + $0x10] sm:$0xff] }
 0x1a8   :  { %871 = vmax.xlane.f32.xlu1 %v2631_v23  ;;  %v2672_v34 = vsel %vm805_vm8, %v821_v6, -1e+30  ;;  %vm678_vm8 = vcmp.eq.s32.totalorder %v2520_v9, %v2522_v25  ;;  %vm815_vm0 = vmand %vm687_vm10, %vm799_vm1 }
 0x1a9   :  { %885 = vmax.xlane.f32.xlu0 %v2638_v26  ;;  %vm792_vm15 = vmxor %vm678_vm8, %vm1960_vm7 }
 0x1aa   :  { %vm808_vm3 = vmand %vm687_vm10, %vm792_vm15 }
 0x1ac   :  { %v2655_v7 = vpop.f32.mrb[6].mxu1  ;;  %887 = vmax.xlane.f32.xlu1 %v2649_v35 }
 0x1ad   :  { %v2661_v30 = vpop.f32.mrb[7].mxu1  ;;  %728 = vadd.xlane.f32.xlu0 %v708_v36  ;;  %v832_v49 = vmul.f32 64.0, %v2655_v7  ;;  %v719_v61 = vsel %vm686_vm11, %v2655_v7, 0.0  ;;  %v690_v7 = vld [vmem:[#allocation5 + $0x10] sm:$0xff] }
 0x1ae   :  { %v1663_v31 = vpop.f32.mrb[6].mxu0  ;;  %v831_v48 = vmul.f32 64.0, %v2661_v30  ;;  %v718_v60 = vsel %vm685_vm9, %v2661_v30, 0.0 }
 0x1af   :  { %v553_v33 = vpop.f32.mrb[7].mxu0  ;;  %v824_v46 = vmul.f32 64.0, %v1663_v31  ;;  %v711_v47 = vsel %vm678_vm8, %v1663_v31, 0.0 }
 0x1b0   :  { %730 = vadd.xlane.f32.xlu1 %v709_v44  ;;  %v823_v42 = vmul.f32 64.0, %v553_v33  ;;  %v710_v24 = vsel %vm677_vm2, %v553_v33, 0.0  ;;  %vm800_vm2 = vmxor %vm686_vm11, %vm1960_vm7  ;;  %v2722_v55 = vsel %vm815_vm0, %v831_v48, -1e+30  ;;  %v691_v33 = vld [vmem:[#allocation5 + $0x18] sm:$0xff] }
 0x1b1   :  { %873 = vmax.xlane.f32.xlu0 %v2672_v34  ;;  %v2717_v52 = vsel %vm808_vm3, %v824_v46, -1e+30  ;;  %vm816_vm7 = vmand %vm687_vm10, %vm800_vm2  ;;  %v2804_v46 = vld [vmem:[#allocation3 + $0x50] sm:$0xff]  ;;  %v703_v44 = vld [vmem:[#allocation5 + $0x78] sm:$0xff] }
 0x1b2   :  { %v2708_v25 = vsel %vm807_vm14, %v823_v42, -1e+30  ;;  %v2727_v56 = vsel %vm816_vm7, %v832_v49, -1e+30 }
 0x1b4   :  { %875 = vmax.xlane.f32.xlu1 %v2680_v51 }
 0x1b5   :  { %889 = vmax.xlane.f32.xlu0 %v2686_v38 }
 0x1b8   :  { %891 = vmax.xlane.f32.xlu1 %v2693_v40 }
 0x1b9   :  { %732 = vadd.xlane.f32.xlu0 %v710_v24  ;;  %v2800_v24 = vld [vmem:[#allocation3 + $0x18] sm:$0xff] }
 0x1bc   :  { %734 = vadd.xlane.f32.xlu1 %v711_v47 }
 0x1bd   :  { %877 = vmax.xlane.f32.xlu0 %v2708_v25 }
 0x1c0   :  { %879 = vmax.xlane.f32.xlu1 %v2717_v52 }
 0x1c1   :  { %893 = vmax.xlane.f32.xlu0 %v2722_v55 }
 0x1c4   :  { %895 = vmax.xlane.f32.xlu1 %v2727_v56 }
 0x1c5   :  { %740 = vadd.xlane.f32.xlu0 %v714_v57 }
 0x1c8   :  { %742 = vadd.xlane.f32.xlu1 %v715_v16 }
 0x1c9   :  { %744 = vadd.xlane.f32.xlu0 %v716_v58  ;;  %v2817_v58 = vld [vmem:[#allocation3 + $0x58] sm:$0xff] }
 0x1cc   :  { %746 = vadd.xlane.f32.xlu1 %v717_v59 }
 0x1cd   :  { %748 = vadd.xlane.f32.xlu0 %v718_v60  ;;  %v692_v60 = vld [vmem:[#allocation5 + $0x20] sm:$0xff] }
 0x1d0   :  { %750 = vadd.xlane.f32.xlu1 %v719_v61 }
 0x21d   :  { %v723_v17 = vpop.xlane.xlu0 %722 }
 0x21e   :  { %v753_v53 = vadd.f32 %v723_v17, %v689_v62 }
 0x220   :  { %770 = vst.msk [vmem:[#allocation5 + $0x8] sm:$0xff] %vm279_vm4, %v753_v53 }
 0x221   :  { %v739_v4 = vpop.xlane.xlu1 %738 }
 0x222   :  { %v761_v28 = vadd.f32 %v739_v4, %v697_v63  ;;  %v737_v1 = vpop.xlane.xlu0 %736 }
 0x223   :  { %v760_v12 = vadd.f32 %v737_v1, %v696_v3  ;;  %v693_v3 = vld [vmem:[#allocation5 + $0x28] sm:$0xff] }
 0x224   :  { %778 = vst.msk [vmem:[#allocation5 + $0x48] sm:$0xff] %vm279_vm4, %v761_v28  ;;  %v2837_v28 = vld [vmem:[#allocation3 + $0x20] sm:$0xff] }
 0x225   :  { %777 = vst.msk [vmem:[#allocation5 + $0x40] sm:$0xff] %vm279_vm4, %v760_v12  ;;  %v721_v9 = vpop.xlane.xlu1 %720 }
 0x226   :  { %v752_v5 = vadd.f32 %v721_v9, %v688_v14  ;;  %v866_v15 = vpop.xlane.xlu0 %865 }
 0x227   :  { %v2757_v18 = vmax.f32 %v2753_v45, %v866_v15  ;;  %v2846_v15 = vld [vmem:[#allocation3 + $0x60] sm:$0xff] }
 0x228   :  { %769 = vst.msk [vmem:[#allocation5] sm:$0xff] %vm279_vm4, %v752_v5  ;;  %v2843_v5 = vld [vmem:[#allocation3 + $0x28] sm:$0xff] }
 0x229   :  { %1185 = vst.msk [vmem:[#allocation3] sm:$0xff] %vm279_vm4, %v2757_v18  ;;  %v868_v20 = vpop.xlane.xlu1 %867 }
 0x22a   :  { %v2769_v29 = vmax.f32 %v2759_v19, %v868_v20  ;;  %v882_v13 = vpop.xlane.xlu0 %881 }
 0x22b   :  { %v2772_v2 = vmax.f32 %v2762_v10, %v882_v13 }
 0x22c   :  { %v914_v6 = vsub.f32 %v2759_v19, %v2769_v29  ;;  %1186 = vst.msk [vmem:[#allocation3 + $0x8] sm:$0xff] %vm279_vm4, %v2769_v29  ;;  %1000 = vperm.xlu1 %1749, %v2769_v29  }
 0x22d   :  { %1193 = vst.msk [vmem:[#allocation3 + $0x40] sm:$0xff] %vm279_vm4, %v2772_v2  ;;  %v884_v30 = vpop.xlane.xlu1 %883 }
 0x22e   :  { %v2786_v31 = vmax.f32 %v2774_v27, %v884_v30  ;;  %v725_v32 = vpop.xlane.xlu0 %724 }
 0x22f   :  { %v754_v43 = vadd.f32 %v725_v32, %v690_v7 }
 0x230   :  { %1194 = vst.msk [vmem:[#allocation3 + $0x48] sm:$0xff] %vm279_vm4, %v2786_v31  ;;  %1040 = vperm.xlu0 %1748, %v2786_v31   ;;  %1035 = vperm.xlu1 %1749, %v2772_v2  }
 0x231   :  { %771 = vst.msk [vmem:[#allocation5 + $0x10] sm:$0xff] %vm279_vm4, %v754_v43  ;;  %v727_v37 = vpop.xlane.xlu1 %726  ;;  %v2859_v43 = vld [vmem:[#allocation3 + $0x68] sm:$0xff] }
 0x232   :  { %v755_v8 = vadd.f32 %v727_v37, %v691_v33  ;;  %v870_v39 = vpop.xlane.xlu0 %869  ;;  %v694_v37 = vld [vmem:[#allocation5 + $0x30] sm:$0xff] }
 0x233   :  { %v2798_v42 = vmax.f32 %v2794_v50, %v870_v39 }
 0x234   :  { %772 = vst.msk [vmem:[#allocation5 + $0x18] sm:$0xff] %vm279_vm4, %v755_v8  ;;  %995 = vperm.xlu0 %1748, %v2757_v18   ;;  %v699_v8 = vld [vmem:[#allocation5 + $0x58] sm:$0xff] }
 0x235   :  { %1187 = vst.msk [vmem:[#allocation3 + $0x10] sm:$0xff] %vm279_vm4, %v2798_v42  ;;  %v872_v48 = vpop.xlane.xlu1 %871  ;;  %1005 = vperm.xlu1 %1749, %v2798_v42  }
 0x236   :  { %v2812_v49 = vmax.f32 %v2800_v24, %v872_v48  ;;  %v886_v57 = vpop.xlane.xlu0 %885 }
 0x237   :  { %v2815_v16 = vmax.f32 %v2804_v46, %v886_v57 }
 0x238   :  { %1188 = vst.msk [vmem:[#allocation3 + $0x18] sm:$0xff] %vm279_vm4, %v2812_v49  ;;  %1010 = vperm.xlu0 %1748, %v2812_v49   ;;  %v3108_v29 = vsub.f32 %v2800_v24, %v2812_v49  ;;  %v970_v49 = vld [vmem:[#allocation4 + $0x48] sm:$0xff] }
 0x239   :  { %1195 = vst.msk [vmem:[#allocation3 + $0x50] sm:$0xff] %vm279_vm4, %v2815_v16  ;;  %v888_v62 = vpop.xlane.xlu1 %887  ;;  %1045 = vperm.xlu1 %1749, %v2815_v16  }
 0x23a   :  { %v2830_v17 = vmax.f32 %v2817_v58, %v888_v62  ;;  %v729_v53 = vpop.xlane.xlu0 %728  ;;  %v695_v62 = vld [vmem:[#allocation5 + $0x38] sm:$0xff] }
 0x23b   :  { %v756_v63 = vadd.f32 %v729_v53, %v692_v60 }
 0x23c   :  { %1196 = vst.msk [vmem:[#allocation3 + $0x58] sm:$0xff] %vm279_vm4, %v2830_v17  ;;  %1050 = vperm.xlu0 %1748, %v2830_v17  }
 0x23d   :  { %773 = vst.msk [vmem:[#allocation5 + $0x20] sm:$0xff] %vm279_vm4, %v756_v63  ;;  %v731_v1 = vpop.xlane.xlu1 %730  ;;  %v2879_v63 = vld [vmem:[#allocation3 + $0x30] sm:$0xff] }
 0x23e   :  { %v757_v12 = vadd.f32 %v731_v1, %v693_v3  ;;  %v874_v14 = vpop.xlane.xlu0 %873 }
 0x23f   :  { %v2841_v9 = vmax.f32 %v2837_v28, %v874_v14 }
 0x240   :  { %774 = vst.msk [vmem:[#allocation5 + $0x28] sm:$0xff] %vm279_vm4, %v757_v12 }
 0x241   :  { %1189 = vst.msk [vmem:[#allocation3 + $0x20] sm:$0xff] %vm279_vm4, %v2841_v9  ;;  %v876_v13 = vpop.xlane.xlu1 %875  ;;  %1015 = vperm.xlu1 %1749, %v2841_v9  }
 0x242   :  { %v2854_v7 = vmax.f32 %v2843_v5, %v876_v13  ;;  %v890_v30 = vpop.xlane.xlu0 %889  ;;  %v2885_v13 = vld [vmem:[#allocation3 + $0x38] sm:$0xff] }
 0x243   :  { %v2857_v32 = vmax.f32 %v2846_v15, %v890_v30  ;;  %v2888_v30 = vld [vmem:[#allocation3 + $0x70] sm:$0xff] }
 0x244   :  { %1190 = vst.msk [vmem:[#allocation3 + $0x28] sm:$0xff] %vm279_vm4, %v2854_v7  ;;  %1020 = vperm.xlu0 %1748, %v2854_v7  }
 0x245   :  { %1197 = vst.msk [vmem:[#allocation3 + $0x60] sm:$0xff] %vm279_vm4, %v2857_v32  ;;  %v892_v39 = vpop.xlane.xlu1 %891  ;;  %1055 = vperm.xlu1 %1749, %v2857_v32  }
 0x246   :  { %v2872_v48 = vmax.f32 %v2859_v43, %v892_v39  ;;  %v733_v57 = vpop.xlane.xlu0 %732 }
 0x247   :  { %v758_v60 = vadd.f32 %v733_v57, %v694_v37  ;;  %v700_v37 = vld [vmem:[#allocation5 + $0x60] sm:$0xff] }
 0x248   :  { %1198 = vst.msk [vmem:[#allocation3 + $0x68] sm:$0xff] %vm279_vm4, %v2872_v48  ;;  %1060 = vperm.xlu0 %1748, %v2872_v48  }
 0x249   :  { %775 = vst.msk [vmem:[#allocation5 + $0x30] sm:$0xff] %vm279_vm4, %v758_v60  ;;  %v735_v3 = vpop.xlane.xlu1 %734 }
 0x24a   :  { %v759_v1 = vadd.f32 %v735_v3, %v695_v62  ;;  %v878_v12 = vpop.xlane.xlu0 %877  ;;  %v2901_v3 = vld [vmem:[#allocation3 + $0x78] sm:$0xff] }
 0x24b   :  { %v2883_v14 = vmax.f32 %v2879_v63, %v878_v12  ;;  %v698_v12 = vld [vmem:[#allocation5 + $0x50] sm:$0xff] }
 0x24c   :  { %776 = vst.msk [vmem:[#allocation5 + $0x38] sm:$0xff] %vm279_vm4, %v759_v1 }
 0x24d   :  { %1191 = vst.msk [vmem:[#allocation3 + $0x30] sm:$0xff] %vm279_vm4, %v2883_v14  ;;  %v880_v39 = vpop.xlane.xlu1 %879  ;;  %1025 = vperm.xlu1 %1749, %v2883_v14  }
 0x24e   :  { %v2896_v57 = vmax.f32 %v2885_v13, %v880_v39  ;;  %v894_v60 = vpop.xlane.xlu0 %893 }
 0x24f   :  { %v2899_v62 = vmax.f32 %v2888_v30, %v894_v60 }
 0x250   :  { %1192 = vst.msk [vmem:[#allocation3 + $0x38] sm:$0xff] %vm279_vm4, %v2896_v57  ;;  %1030 = vperm.xlu0 %1748, %v2896_v57  }
 0x251   :  { %1199 = vst.msk [vmem:[#allocation3 + $0x70] sm:$0xff] %vm279_vm4, %v2899_v62  ;;  %v896_v39 = vpop.xlane.xlu1 %895  ;;  %1065 = vperm.xlu1 %1749, %v2899_v62  }
 0x252   :  { %v2914_v60 = vmax.f32 %v2901_v3, %v896_v39  ;;  %v741_v53 = vpop.xlane.xlu0 %740  ;;  %v701_v39 = vld [vmem:[#allocation5 + $0x68] sm:$0xff] }
 0x253   :  { %v762_v1 = vadd.f32 %v741_v53, %v698_v12  ;;  %v702_v53 = vld [vmem:[#allocation5 + $0x70] sm:$0xff] }
 0x254   :  { %1200 = vst.msk [vmem:[#allocation3 + $0x78] sm:$0xff] %vm279_vm4, %v2914_v60  ;;  %1070 = vperm.xlu0 %1748, %v2914_v60  }
 0x255   :  { %779 = vst.msk [vmem:[#allocation5 + $0x50] sm:$0xff] %vm279_vm4, %v762_v1  ;;  %v743_v20 = vpop.xlane.xlu1 %742 }
 0x256   :  { %v763_v4 = vadd.f32 %v743_v20, %v699_v8  ;;  %v745_v61 = vpop.xlane.xlu0 %744 }
 0x257   :  { %v764_v59 = vadd.f32 %v745_v61, %v700_v37 }
 0x258   :  { %780 = vst.msk [vmem:[#allocation5 + $0x58] sm:$0xff] %vm279_vm4, %v763_v4 }
 0x259   :  { %781 = vst.msk [vmem:[#allocation5 + $0x60] sm:$0xff] %vm279_vm4, %v764_v59  ;;  %v747_v12 = vpop.xlane.xlu1 %746 }
 0x25a   :  { %v765_v33 = vadd.f32 %v747_v12, %v701_v39  ;;  %v749_v47 = vpop.xlane.xlu0 %748 }
 0x25b   :  { %v766_v21 = vadd.f32 %v749_v47, %v702_v53 }
 0x25c   :  { %782 = vst.msk [vmem:[#allocation5 + $0x68] sm:$0xff] %vm279_vm4, %v765_v33 }
 0x25d   :  { %783 = vst.msk [vmem:[#allocation5 + $0x70] sm:$0xff] %vm279_vm4, %v766_v21  ;;  %v751_v1 = vpop.xlane.xlu1 %750 }
 0x25e   :  { %v767_v36 = vadd.f32 %v751_v1, %v703_v44 }
 0x260   :  { %784 = vst.msk [vmem:[#allocation5 + $0x78] sm:$0xff] %vm279_vm4, %v767_v36 }
 0x2ab   :  { %v1001_v61 = vpop.permute.xlu1 %1000 }
 0x2ac   :  { %v1074_v20 = vsub.f32 %v2556_v54, %v1001_v61 }
 0x2ae   :  { %v1091_v4 = vmul.f32 1.442695, %v1074_v20 }
 0x2af   :  { %v1036_v8 = vpop.permute.xlu1 %1035  ;;  %v1041_v37 = vpop.permute.xlu0 %1040 }
 0x2b0   :  { %1814 = vpow2.f32 %v1091_v4  ;;  %v1081_v59 = vsub.f32 %v2562_v0, %v1036_v8  ;;  %v1082_v47 = vsub.f32 %v2570_v11, %v1041_v37 }
 0x2b2   :  { %v1105_v39 = vmul.f32 1.442695, %v1081_v59  ;;  %v1107_v53 = vmul.f32 1.442695, %v1082_v47 }
 0x2b3   :  { %v996_v33 = vpop.permute.xlu0 %995 }
 0x2b4   :  { %1816 = vpow2.f32 %v1105_v39  ;;  %v1073_v21 = vsub.f32 %v2546_v41, %v996_v33  ;;  %v1006_v44 = vpop.permute.xlu1 %1005 }
 0x2b5   :  { %1818 = vpow2.f32 %v1107_v53  ;;  %v1075_v36 = vsub.f32 %v2601_v22, %v1006_v44 }
 0x2b6   :  { %v1089_v12 = vmul.f32 1.442695, %v1073_v21 }
 0x2b7   :  { %v1093_v54 = vmul.f32 1.442695, %v1075_v36  ;;  %v1011_v1 = vpop.permute.xlu0 %1010 }
 0x2b8   :  { %1820 = vpow2.f32 %v1089_v12  ;;  %v1076_v61 = vsub.f32 %v2631_v23, %v1011_v1  ;;  %v1046_v20 = vpop.permute.xlu1 %1045 }
 0x2b9   :  { %1822 = vpow2.f32 %v1093_v54  ;;  %v1083_v0 = vsub.f32 %v2638_v26, %v1046_v20 }
 0x2ba   :  { %v1815_v11 = vpop.eup %1814  ;;  %v1095_v4 = vmul.f32 1.442695, %v1076_v61 }
 0x2bb   :  { %v1109_v8 = vmul.f32 1.442695, %v1083_v0  ;;  %1123 = vadd.xlane.f32.xlu0 %v1815_v11  ;;  %v1051_v37 = vpop.permute.xlu0 %1050 }
 0x2bc   :  { %1824 = vpow2.f32 %v1095_v4  ;;  %v1084_v41 = vsub.f32 %v2649_v35, %v1051_v37 }
 0x2bd   :  { %1826 = vpow2.f32 %v1109_v8 }
 0x2be   :  { %v1817_v22 = vpop.eup %1816  ;;  %v1111_v59 = vmul.f32 1.442695, %v1084_v41 }
 0x2bf   :  { %v1819_v47 = vpop.eup %1818  ;;  %1137 = vadd.xlane.f32.xlu0 %v1817_v22 }
 0x2c0   :  { %1828 = vpow2.f32 %v1111_v59  ;;  %1139 = vadd.xlane.f32.xlu1 %v1819_v47  ;;  %v1016_v23 = vpop.permute.xlu1 %1015 }
 0x2c1   :  { %v1077_v39 = vsub.f32 %v2672_v34, %v1016_v23 }
 0x2c2   :  { %v1821_v53 = vpop.eup %1820 }
 0x2c3   :  { %v1823_v26 = vpop.eup %1822  ;;  %v1097_v33 = vmul.f32 1.442695, %v1077_v39  ;;  %v1021_v21 = vpop.permute.xlu0 %1020 }
 0x2c4   :  { %1121 = vadd.xlane.f32.xlu1 %v1821_v53  ;;  %v1078_v44 = vsub.f32 %v2680_v51, %v1021_v21  ;;  %1125 = vadd.xlane.f32.xlu0 %v1823_v26  ;;  %v1056_v36 = vpop.permute.xlu1 %1055 }
 0x2c5   :  { %1830 = vpow2.f32 %v1097_v33  ;;  %v1085_v35 = vsub.f32 %v2686_v38, %v1056_v36  ;;  %v1317_v36 = vld [vmem:[#allocation5 + $0x8] sm:$0xff] }
 0x2c6   :  { %v1825_v12 = vpop.eup %1824  ;;  %v1099_v54 = vmul.f32 1.442695, %v1078_v44 }
 0x2c7   :  { %v1827_v1 = vpop.eup %1826  ;;  %v1113_v61 = vmul.f32 1.442695, %v1085_v35  ;;  %v1061_v20 = vpop.permute.xlu0 %1060  ;;  %v1316_v35 = vld [vmem:[#allocation5] sm:$0xff] }
 0x2c8   :  { %1832 = vpow2.f32 %v1099_v54  ;;  %1127 = vadd.xlane.f32.xlu1 %v1825_v12  ;;  %v1086_v34 = vsub.f32 %v2693_v40, %v1061_v20  ;;  %1141 = vadd.xlane.f32.xlu0 %v1827_v1  ;;  %v1318_v12 = vld [vmem:[#allocation5 + $0x10] sm:$0xff]  ;;  %v1320_v54 = vld [vmem:[#allocation5 + $0x20] sm:$0xff]  ;;  %v1321_v1 = vld [vmem:[#allocation5 + $0x28] sm:$0xff] }
 0x2c9   :  { %1834 = vpow2.f32 %v1113_v61  ;;  %v1322_v61 = vld [vmem:[#allocation5 + $0x30] sm:$0xff]  ;;  %v1323_v20 = vld [vmem:[#allocation5 + $0x38] sm:$0xff] }
 0x2ca   :  { %v1829_v0 = vpop.eup %1828  ;;  %v1115_v11 = vmul.f32 1.442695, %v1086_v34  ;;  %v1324_v34 = vld [vmem:[#allocation5 + $0x40] sm:$0xff] }
 0x2cc   :  { %1836 = vpow2.f32 %v1115_v11  ;;  %1143 = vadd.xlane.f32.xlu1 %v1829_v0  ;;  %v1026_v51 = vpop.permute.xlu1 %1025  ;;  %v1325_v0 = vld [vmem:[#allocation5 + $0x48] sm:$0xff]  ;;  %v1326_v11 = vld [vmem:[#allocation5 + $0x50] sm:$0xff] }
 0x2cd   :  { %v1079_v4 = vsub.f32 %v2708_v25, %v1026_v51  ;;  %v1327_v51 = vld [vmem:[#allocation5 + $0x58] sm:$0xff] }
 0x2cf   :  { %v1831_v8 = vpop.eup %1830  ;;  %v1101_v38 = vmul.f32 1.442695, %v1079_v4  ;;  %v1031_v37 = vpop.permute.xlu0 %1030  ;;  %v1328_v4 = vld [vmem:[#allocation5 + $0x60] sm:$0xff] }
 0x2d0   :  { %v1080_v41 = vsub.f32 %v2717_v52, %v1031_v37  ;;  %1129 = vadd.xlane.f32.xlu0 %v1831_v8  ;;  %v1066_v22 = vpop.permute.xlu1 %1065  ;;  %v1329_v8 = vld [vmem:[#allocation5 + $0x68] sm:$0xff]  ;;  %v1331_v37 = vld [vmem:[#allocation5 + $0x78] sm:$0xff] }
 0x2d1   :  { %1838 = vpow2.f32 %v1101_v38  ;;  %v1087_v59 = vsub.f32 %v2722_v55, %v1066_v22  ;;  %v1330_v38 = vld [vmem:[#allocation5 + $0x70] sm:$0xff]  ;;  %v3104_v22 = vsub.f32 %v2762_v10, %v2772_v2  ;;  %v935_v10 = vmul.f32 1.442695, %v3108_v29 }
 0x2d2   :  { %v1833_v40 = vpop.eup %1832  ;;  %v1103_v47 = vmul.f32 1.442695, %v1080_v41  ;;  %v931_v41 = vmul.f32 1.442695, %v914_v6  ;;  %v3109_v2 = vsub.f32 %v2804_v46, %v2815_v16  ;;  %v3111_v46 = vsub.f32 %v2837_v28, %v2841_v9 }
 0x2d3   :  { %v1835_v23 = vpop.eup %1834  ;;  %v1117_v39 = vmul.f32 1.442695, %v1087_v59  ;;  %1131 = vadd.xlane.f32.xlu1 %v1833_v40  ;;  %v1071_v53 = vpop.permute.xlu0 %1070  ;;  %v945_v59 = vmul.f32 1.442695, %v3104_v22  ;;  %v3105_v40 = vsub.f32 %v2774_v27, %v2786_v31  ;;  %v962_v31 = vld [vmem:[#allocation4 + $0x8] sm:$0xff] }
 0x2d4   :  { %1840 = vpow2.f32 %v1103_v47  ;;  %v1088_v26 = vsub.f32 %v2727_v56, %v1071_v53  ;;  %1145 = vadd.xlane.f32.xlu0 %v1835_v23  ;;  %v1319_v56 = vld [vmem:[#allocation5 + $0x18] sm:$0xff]  ;;  %v3106_v23 = vsub.f32 %v2753_v45, %v2757_v18  ;;  %v3107_v53 = vsub.f32 %v2794_v50, %v2798_v42 }
 0x2d5   :  { %1842 = vpow2.f32 %v1117_v39  ;;  %v947_v47 = vmul.f32 1.442695, %v3105_v40  ;;  %v949_v27 = vmul.f32 1.442695, %v3109_v2  ;;  %v3110_v45 = vsub.f32 %v2817_v58, %v2830_v17 }
 0x2d6   :  { %v1837_v25 = vpop.eup %1836  ;;  %v1119_v33 = vmul.f32 1.442695, %v1088_v26  ;;  %v929_v39 = vmul.f32 1.442695, %v3106_v23  ;;  %v933_v19 = vmul.f32 1.442695, %v3107_v53  ;;  %v3112_v17 = vsub.f32 %v2843_v5, %v2854_v7 }
 0x2d7   :  { %1147 = vadd.xlane.f32.xlu1 %v1837_v25  ;;  %v951_v18 = vmul.f32 1.442695, %v3110_v45  ;;  %v969_v25 = vld [vmem:[#allocation4 + $0x40] sm:$0xff]  ;;  %v937_v16 = vmul.f32 1.442695, %v3111_v46  ;;  %v3118_v45 = vsub.f32 %v2901_v3, %v2914_v60  ;;  %v1237_v46 = vld [vmem:[#allocation3 + $0x8] sm:$0xff] }
 0x2d8   :  { %1844 = vpow2.f32 %v1119_v33 }
 0x2d9   :  { %1846 = vpow2.f32 %v931_v41 }
 0x2da   :  { %1848 = vpow2.f32 %v945_v59 }
 0x2db   :  { %v1839_v52 = vpop.eup %1838  ;;  %1850 = vpow2.f32 %v947_v47  ;;  %v972_v47 = vld [vmem:[#allocation4 + $0x58] sm:$0xff] }
 0x2dc   :  { %1133 = vadd.xlane.f32.xlu0 %v1839_v52  ;;  %1852 = vpow2.f32 %v929_v39 }
 0x2dd   :  { %1854 = vpow2.f32 %v933_v19  ;;  %v3116_v19 = vsub.f32 %v2885_v13, %v2896_v57 }
 0x2de   :  { %v1841_v21 = vpop.eup %1840  ;;  %1856 = vpow2.f32 %v935_v10 }
 0x2df   :  { %v1843_v44 = vpop.eup %1842  ;;  %1135 = vadd.xlane.f32.xlu1 %v1841_v21  ;;  %1858 = vpow2.f32 %v949_v27  ;;  %v943_v29 = vmul.f32 1.442695, %v3116_v19 }
 0x2e0   :  { %1149 = vadd.xlane.f32.xlu0 %v1843_v44  ;;  %1860 = vpow2.f32 %v951_v18  ;;  %v959_v18 = vmul.f32 1.442695, %v3118_v45 }
 0x2e1   :  { %1862 = vpow2.f32 %v937_v16 }
 0x2e2   :  { %v1845_v55 = vpop.eup %1844 }
 0x2e3   :  { %1151 = vadd.xlane.f32.xlu1 %v1845_v55  ;;  %v1847_v6 = vpop.eup %1846 }
 0x2e4   :  { %v978_v50 = vmul.f32 %v1847_v6, %v962_v31  ;;  %v1849_v42 = vpop.eup %1848  ;;  %v3117_v6 = vsub.f32 %v2888_v30, %v2899_v62 }
 0x2e5   :  { %v1851_v33 = vpop.eup %1850  ;;  %v985_v52 = vmul.f32 %v1849_v42, %v969_v25 }
 0x2e6   :  { %v1853_v21 = vpop.eup %1852  ;;  %v986_v44 = vmul.f32 %v1851_v33, %v970_v49  ;;  %v957_v13 = vmul.f32 1.442695, %v3117_v6  ;;  %v966_v33 = vld [vmem:[#allocation4 + $0x28] sm:$0xff] }
 0x2e7   :  { %v1855_v58 = vpop.eup %1854 }
 0x2f4   :  { %1339 = vperm.xlu1 %1749, %v1317_v36   ;;  %v939_v36 = vmul.f32 1.442695, %v3112_v17  ;;  %v974_v17 = vld [vmem:[#allocation4 + $0x68] sm:$0xff] }
 0x2f6   :  { %1334 = vperm.xlu0 %1748, %v1316_v35   ;;  %1864 = vpow2.f32 %v939_v36 }
 0x2f8   :  { %1344 = vperm.xlu1 %1749, %v1318_v12  }
 0x2fa   :  { %1349 = vperm.xlu0 %1748, %v1319_v56   ;;  %v961_v56 = vld [vmem:[#allocation4] sm:$0xff] }
 0x2fc   :  { %1354 = vperm.xlu1 %1749, %v1320_v54   ;;  %v963_v54 = vld [vmem:[#allocation4 + $0x10] sm:$0xff] }
 0x2fe   :  { %1359 = vperm.xlu0 %1748, %v1321_v1   ;;  %v3113_v1 = vsub.f32 %v2846_v15, %v2857_v32  ;;  %v3114_v15 = vsub.f32 %v2859_v43, %v2872_v48  ;;  %v3115_v43 = vsub.f32 %v2879_v63, %v2883_v14  ;;  %v965_v14 = vld [vmem:[#allocation4 + $0x20] sm:$0xff] }
 0x300   :  { %1364 = vperm.xlu1 %1749, %v1322_v61   ;;  %v953_v28 = vmul.f32 1.442695, %v3113_v1  ;;  %v1857_v61 = vpop.eup %1856  ;;  %v955_v32 = vmul.f32 1.442695, %v3114_v15  ;;  %v941_v48 = vmul.f32 1.442695, %v3115_v43 }
 0x302   :  { %1369 = vperm.xlu0 %1748, %v1323_v20   ;;  %v977_v20 = vmul.f32 %v1853_v21, %v961_v56  ;;  %1866 = vpow2.f32 %v953_v28 }
 0x304   :  { %1374 = vperm.xlu1 %1749, %v1324_v34   ;;  %v979_v34 = vmul.f32 %v1855_v58, %v963_v54 }
 0x306   :  { %1379 = vperm.xlu0 %1748, %v1325_v0   ;;  %v1859_v0 = vpop.eup %1858 }
 0x307   :  { %v1861_v22 = vpop.eup %1860 }
 0x308   :  { %1384 = vperm.xlu1 %1749, %v1326_v11   ;;  %v964_v11 = vld [vmem:[#allocation4 + $0x18] sm:$0xff]  ;;  %v988_v2 = vmul.f32 %v1861_v22, %v972_v47  ;;  %v1863_v27 = vpop.eup %1862 }
 0x309   :  { %v1865_v31 = vpop.eup %1864  ;;  %v981_v25 = vmul.f32 %v1863_v27, %v965_v14 }
 0x30a   :  { %1389 = vperm.xlu0 %1748, %v1327_v51   ;;  %v971_v51 = vld [vmem:[#allocation4 + $0x50] sm:$0xff]  ;;  %v982_v60 = vmul.f32 %v1865_v31, %v966_v33 }
 0x30b   :  { %v987_v41 = vmul.f32 %v1859_v0, %v971_v51  ;;  %v1245_v0 = vld [vmem:[#allocation3 + $0x48] sm:$0xff]  ;;  %v967_v51 = vld [vmem:[#allocation4 + $0x30] sm:$0xff] }
 0x30c   :  { %1394 = vperm.xlu1 %1749, %v1328_v4  }
 0x30e   :  { %1399 = vperm.xlu0 %1748, %v1329_v8  }
 0x310   :  { %1404 = vperm.xlu1 %1749, %v1330_v38  }
 0x312   :  { %1409 = vperm.xlu0 %1748, %v1331_v37   ;;  %v980_v37 = vmul.f32 %v1857_v61, %v964_v11 }
 0x348   :  { %v1124_v26 = vpop.xlane.xlu0 %1123 }
 0x349   :  { %v1154_v24 = vadd.f32 %v1124_v26, %v978_v50  ;;  %v1867_v26 = vpop.eup %1866 }
 0x34b   :  { %1170 = vst.msk [vmem:[#allocation4 + $0x8] sm:$0xff] %vm279_vm4, %v1154_v24  ;;  %v973_v24 = vld [vmem:[#allocation4 + $0x60] sm:$0xff] }
 0x34c   :  { %v1138_v55 = vpop.xlane.xlu0 %1137 }
 0x34d   :  { %v1140_v35 = vpop.xlane.xlu1 %1139  ;;  %v1161_v12 = vadd.f32 %v1138_v55, %v985_v52  ;;  %v989_v55 = vmul.f32 %v1867_v26, %v973_v24  ;;  %v1239_v26 = vld [vmem:[#allocation3 + $0x18] sm:$0xff] }
 0x34e   :  { %v1162_v9 = vadd.f32 %v1140_v35, %v986_v44 }
 0x34f   :  { %1177 = vst.msk [vmem:[#allocation4 + $0x40] sm:$0xff] %vm279_vm4, %v1161_v12 }
 0x350   :  { %1178 = vst.msk [vmem:[#allocation4 + $0x48] sm:$0xff] %vm279_vm4, %v1162_v9 }
 0x351   :  { %v1122_v5 = vpop.xlane.xlu1 %1121  ;;  %v1126_v7 = vpop.xlane.xlu0 %1125 }
 0x352   :  { %v1153_v4 = vadd.f32 %v1122_v5, %v977_v20  ;;  %v1155_v8 = vadd.f32 %v1126_v7, %v979_v34  ;;  %v2982_v38 = vld [vmem:[#allocation4 + $0x8] sm:$0xff] }
 0x353   :  { %1868 = vlog2.f32 %v2982_v38  ;;  %vm1221_vm10 = vcmp.gt.f32.partialorder %v2982_v38, 0.0 }
 0x354   :  { %1169 = vst.msk [vmem:[#allocation4] sm:$0xff] %vm279_vm4, %v1153_v4  ;;  %1171 = vst.msk [vmem:[#allocation4 + $0x10] sm:$0xff] %vm279_vm4, %v1155_v8  ;;  %1870 = vpow2.f32 %v955_v32 }
 0x355   :  { %v1128_v59 = vpop.xlane.xlu1 %1127  ;;  %v1142_v40 = vpop.xlane.xlu0 %1141 }
 0x356   :  { %v1156_v23 = vadd.f32 %v1128_v59, %v980_v37  ;;  %v1163_v39 = vadd.f32 %v1142_v40, %v987_v41  ;;  %v2990_v53 = vld [vmem:[#allocation4 + $0x40] sm:$0xff]  ;;  %v968_v40 = vld [vmem:[#allocation4 + $0x38] sm:$0xff] }
 0x357   :  { %v2995_v10 = vld [vmem:[#allocation4 + $0x48] sm:$0xff]  ;;  %v1236_v59 = vld [vmem:[#allocation3] sm:$0xff]  ;;  %vm1228_vm5 = vcmp.gt.f32.partialorder %v2990_v53, 0.0 }
 0x358   :  { %1172 = vst.msk [vmem:[#allocation4 + $0x18] sm:$0xff] %vm279_vm4, %v1156_v23  ;;  %1179 = vst.msk [vmem:[#allocation4 + $0x50] sm:$0xff] %vm279_vm4, %v1163_v39  ;;  %1872 = vlog2.f32 %v2995_v10  ;;  %vm1229_vm6 = vcmp.gt.f32.partialorder %v2995_v10, 0.0  ;;  %v975_v23 = vld [vmem:[#allocation4 + $0x70] sm:$0xff]  ;;  %v1244_v39 = vld [vmem:[#allocation3 + $0x40] sm:$0xff] }
 0x359   :  { %v1144_v63 = vpop.xlane.xlu1 %1143  ;;  %1874 = vlog2.f32 %v2990_v53 }
 0x35a   :  { %1876 = vpow2.f32 %v941_v48  ;;  %v1164_v57 = vadd.f32 %v1144_v63, %v988_v2  ;;  %v976_v2 = vld [vmem:[#allocation4 + $0x78] sm:$0xff] }
 0x35b   :  { %1878 = vpow2.f32 %v943_v29  ;;  %v3007_v50 = vld [vmem:[#allocation4] sm:$0xff]  ;;  %v3009_v42 = vld [vmem:[#allocation4 + $0x10] sm:$0xff] }
 0x35c   :  { %1180 = vst.msk [vmem:[#allocation4 + $0x58] sm:$0xff] %vm279_vm4, %v1164_v57  ;;  %1880 = vlog2.f32 %v3007_v50  ;;  %vm1220_vm12 = vcmp.gt.f32.partialorder %v3007_v50, 0.0  ;;  %vm1222_vm8 = vcmp.gt.f32.partialorder %v3009_v42, 0.0 }
 0x35d   :  { %v1869_v30 = vpop.eup %1868  ;;  %v1130_v62 = vpop.xlane.xlu0 %1129  ;;  %1882 = vlog2.f32 %v3009_v42 }
 0x35e   :  { %1884 = vpow2.f32 %v957_v13  ;;  %v1157_v49 = vadd.f32 %v1130_v62, %v981_v25  ;;  %v1255_v3 = vmul.f32 0.6931472, %v1869_v30  ;;  %v1871_v21 = vpop.eup %1870  ;;  %v1238_v62 = vld [vmem:[#allocation3 + $0x10] sm:$0xff] }
 0x35f   :  { %1886 = vpow2.f32 %v959_v18  ;;  %v3014_v16 = vld [vmem:[#allocation4 + $0x18] sm:$0xff]  ;;  %v3016_v52 = vld [vmem:[#allocation4 + $0x50] sm:$0xff]  ;;  %v990_v28 = vmul.f32 %v1871_v21, %v974_v17 }
 0x360   :  { %1173 = vst.msk [vmem:[#allocation4 + $0x20] sm:$0xff] %vm279_vm4, %v1157_v49  ;;  %v1132_v44 = vpop.xlane.xlu1 %1131  ;;  %v1285_v58 = vadd.f32 %v1255_v3, %v1237_v46  ;;  %1888 = vlog2.f32 %v3014_v16  ;;  %vm1223_vm13 = vcmp.gt.f32.partialorder %v3014_v16, 0.0  ;;  %vm1230_vm11 = vcmp.gt.f32.partialorder %v3016_v52, 0.0 }
 0x361   :  { %v1158_v36 = vadd.f32 %v1132_v44, %v982_v60  ;;  %v1146_v35 = vpop.xlane.xlu0 %1145  ;;  %1890 = vlog2.f32 %v3016_v52  ;;  %v1248_v52 = vld [vmem:[#allocation3 + $0x60] sm:$0xff] }
 0x362   :  { %v1873_v12 = vpop.eup %1872  ;;  %v1165_v56 = vadd.f32 %v1146_v35, %v989_v55  ;;  %v1301_v54 = vsel %vm1221_vm10, %v1285_v58, -1e+30  ;;  %v1247_v58 = vld [vmem:[#allocation3 + $0x58] sm:$0xff] }
 0x363   :  { %v1875_v1 = vpop.eup %1874  ;;  %1174 = vst.msk [vmem:[#allocation4 + $0x28] sm:$0xff] %vm279_vm4, %v1158_v36  ;;  %1435 = vperm.xlu0 %1748, %v1301_v54   ;;  %v1271_v9 = vmul.f32 0.6931472, %v1873_v12  ;;  %v3023_v61 = vld [vmem:[#allocation4 + $0x58] sm:$0xff]  ;;  %v1246_v12 = vld [vmem:[#allocation3 + $0x50] sm:$0xff] }
 0x364   :  { %v1877_v20 = vpop.eup %1876  ;;  %1181 = vst.msk [vmem:[#allocation4 + $0x60] sm:$0xff] %vm279_vm4, %v1165_v56  ;;  %v1148_v34 = vpop.xlane.xlu1 %1147  ;;  %1892 = vlog2.f32 %v3023_v61  ;;  %v1269_v32 = vmul.f32 0.6931472, %v1875_v1  ;;  %vm1231_vm9 = vcmp.gt.f32.partialorder %v3023_v61, 0.0 }
 0x365   :  { %v1879_v5 = vpop.eup %1878  ;;  %v1166_v7 = vadd.f32 %v1148_v34, %v990_v28  ;;  %v1293_v11 = vadd.f32 %v1271_v9, %v1245_v0  ;;  %v983_v22 = vmul.f32 %v1877_v20, %v967_v51  ;;  %v1240_v0 = vld [vmem:[#allocation3 + $0x20] sm:$0xff] }
 0x366   :  { %v1881_v15 = vpop.eup %1880  ;;  %v1292_v10 = vadd.f32 %v1269_v32, %v1244_v39  ;;  %v984_v6 = vmul.f32 %v1879_v5, %v968_v40 }
 0x367   :  { %v1883_v4 = vpop.eup %1882  ;;  %1182 = vst.msk [vmem:[#allocation4 + $0x68] sm:$0xff] %vm279_vm4, %v1166_v7  ;;  %v1309_v8 = vsel %vm1229_vm6, %v1293_v11, -1e+30  ;;  %v1253_v38 = vmul.f32 0.6931472, %v1881_v15  ;;  %v3029_v37 = vld [vmem:[#allocation4 + $0x20] sm:$0xff] }
 0x368   :  { %v1885_v41 = vpop.eup %1884  ;;  %1475 = vperm.xlu0 %1748, %v1309_v8   ;;  %1894 = vlog2.f32 %v3029_v37  ;;  %v1257_v27 = vmul.f32 0.6931472, %v1883_v4  ;;  %v1308_v3 = vsel %vm1228_vm5, %v1292_v10, -1e+30  ;;  %v1241_v11 = vld [vmem:[#allocation3 + $0x28] sm:$0xff]  ;;  %vm1224_vm14 = vcmp.gt.f32.partialorder %v3029_v37, 0.0 }
 0x369   :  { %v1887_v47 = vpop.eup %1886  ;;  %v1134_v43 = vpop.xlane.xlu0 %1133  ;;  %v1284_v48 = vadd.f32 %v1253_v38, %v1236_v59  ;;  %v991_v18 = vmul.f32 %v1885_v41, %v975_v23 }
 0x36a   :  { %v1889_v19 = vpop.eup %1888  ;;  %v1159_v29 = vadd.f32 %v1134_v43, %v983_v22  ;;  %v3033_v63 = vld [vmem:[#allocation4 + $0x28] sm:$0xff]  ;;  %v992_v30 = vmul.f32 %v1887_v47, %v976_v2  ;;  %v1286_v60 = vadd.f32 %v1257_v27, %v1238_v62 }
 0x36b   :  { %v1300_v14 = vsel %vm1220_vm12, %v1284_v48, -1e+30  ;;  %v1259_v13 = vmul.f32 0.6931472, %v1889_v19  ;;  %1896 = vlog2.f32 %v3033_v63  ;;  %v3036_v57 = vld [vmem:[#allocation4 + $0x60] sm:$0xff]  ;;  %v1891_v31 = vpop.eup %1890  ;;  %v1249_v43 = vld [vmem:[#allocation3 + $0x68] sm:$0xff] }
 0x36c   :  { %1175 = vst.msk [vmem:[#allocation4 + $0x30] sm:$0xff] %vm279_vm4, %v1159_v29  ;;  %1430 = vperm.xlu1 %1749, %v1300_v14   ;;  %v1136_v45 = vpop.xlane.xlu1 %1135  ;;  %1898 = vlog2.f32 %v3036_v57  ;;  %v1273_v55 = vmul.f32 0.6931472, %v1891_v31  ;;  %v1302_v35 = vsel %vm1222_vm8, %v1286_v60, -1e+30  ;;  %vm1232_vm1 = vcmp.gt.f32.partialorder %v3036_v57, 0.0 }
 0x36d   :  { %v1160_v50 = vadd.f32 %v1136_v45, %v984_v6  ;;  %v1150_v25 = vpop.xlane.xlu0 %1149  ;;  %v1287_v33 = vadd.f32 %v1259_v13, %v1239_v26  ;;  %v1243_v26 = vld [vmem:[#allocation3 + $0x38] sm:$0xff] }
 0x36e   :  { %v1893_v24 = vpop.eup %1892  ;;  %v1167_v49 = vadd.f32 %v1150_v25, %v991_v18  ;;  %v3042_v46 = vld [vmem:[#allocation4 + $0x68] sm:$0xff]  ;;  %v1294_v54 = vadd.f32 %v1273_v55, %v1246_v12 }
 0x36f   :  { %1176 = vst.msk [vmem:[#allocation4 + $0x38] sm:$0xff] %vm279_vm4, %v1160_v50  ;;  %v1303_v21 = vsel %vm1223_vm13, %v1287_v33, -1e+30  ;;  %v1275_v44 = vmul.f32 0.6931472, %v1893_v24  ;;  %1900 = vlog2.f32 %v3042_v46  ;;  %vm1233_vm15 = vcmp.gt.f32.partialorder %v3042_v46, 0.0 }
 0x370   :  { %1183 = vst.msk [vmem:[#allocation4 + $0x70] sm:$0xff] %vm279_vm4, %v1167_v49  ;;  %1445 = vperm.xlu0 %1748, %v1303_v21   ;;  %1470 = vperm.xlu1 %1749, %v1308_v3   ;;  %v1152_v53 = vpop.xlane.xlu1 %1151  ;;  %v1310_v7 = vsel %vm1230_vm11, %v1294_v54, -1e+30  ;;  %v1250_v33 = vld [vmem:[#allocation3 + $0x70] sm:$0xff]  ;;  %v1251_v46 = vld [vmem:[#allocation3 + $0x78] sm:$0xff] }
 0x371   :  { %v1168_v17 = vadd.f32 %v1152_v53, %v992_v30  ;;  %v1295_v36 = vadd.f32 %v1275_v44, %v1247_v58 }
 0x372   :  { %v1895_v16 = vpop.eup %1894 }
 0x373   :  { %1184 = vst.msk [vmem:[#allocation4 + $0x78] sm:$0xff] %vm279_vm4, %v1168_v17  ;;  %v1311_v56 = vsel %vm1231_vm9, %v1295_v36, -1e+30  ;;  %v1261_v1 = vmul.f32 0.6931472, %v1895_v16  ;;  %v3050_v28 = vld [vmem:[#allocation4 + $0x30] sm:$0xff] }
 0x374   :  { %1485 = vperm.xlu0 %1748, %v1311_v56   ;;  %1440 = vperm.xlu1 %1749, %v1302_v35   ;;  %v1340_v9 = vpop.permute.xlu1 %1339  ;;  %1902 = vlog2.f32 %v3050_v28  ;;  %vm1225_vm4 = vcmp.gt.f32.partialorder %v3033_v63, 0.0  ;;  %v1242_v63 = vld [vmem:[#allocation3 + $0x30] sm:$0xff]  ;;  %vm1226_vm2 = vcmp.gt.f32.partialorder %v3050_v28, 0.0 }
 0x375   :  { %v1897_v20 = vpop.eup %1896  ;;  %1413 = vst [vmem:[#allocation6 + $0x8] sm:$0xff] %v1340_v9  ;;  %v1335_v42 = vpop.permute.xlu0 %1334  ;;  %v1288_v51 = vadd.f32 %v1261_v1, %v1240_v0 }
 0x376   :  { %v1899_v34 = vpop.eup %1898  ;;  %1412 = vst [vmem:[#allocation6] sm:$0xff] %v1335_v42  ;;  %v1263_v61 = vmul.f32 0.6931472, %v1897_v20  ;;  %v3054_v5 = vld [vmem:[#allocation4 + $0x38] sm:$0xff] }
 0x377   :  { %v1277_v15 = vmul.f32 0.6931472, %v1899_v34  ;;  %1904 = vlog2.f32 %v3054_v5  ;;  %v1218_v32 = vld [vmem:[#allocation4 + $0x70] sm:$0xff]  ;;  %v1304_v47 = vsel %vm1224_vm14, %v1288_v51, -1e+30  ;;  %vm1227_vm3 = vcmp.gt.f32.partialorder %v3054_v5, 0.0 }
 0x378   :  { %1480 = vperm.xlu1 %1749, %v1310_v7   ;;  %v1345_v4 = vpop.permute.xlu1 %1344  ;;  %v1289_v8 = vadd.f32 %v1263_v61, %v1241_v11  ;;  %1906 = vlog2.f32 %v1218_v32  ;;  %vm1234_vm0 = vcmp.gt.f32.partialorder %v1218_v32, 0.0 }
 0x379   :  { %v1901_v38 = vpop.eup %1900  ;;  %1414 = vst [vmem:[#allocation6 + $0x10] sm:$0xff] %v1345_v4  ;;  %v1350_v41 = vpop.permute.xlu0 %1349  ;;  %v1296_v48 = vadd.f32 %v1277_v15, %v1248_v52 }
 0x37a   :  { %1415 = vst [vmem:[#allocation6 + $0x18] sm:$0xff] %v1350_v41  ;;  %v1305_v22 = vsel %vm1225_vm4, %v1289_v8, -1e+30  ;;  %v1279_v59 = vmul.f32 0.6931472, %v1901_v38  ;;  %v1219_v40 = vld [vmem:[#allocation4 + $0x78] sm:$0xff] }
 0x37b   :  { %1455 = vperm.xlu0 %1748, %v1305_v22   ;;  %1908 = vlog2.f32 %v1219_v40  ;;  %v1312_v37 = vsel %vm1232_vm1, %v1296_v48, -1e+30  ;;  %vm1235_vm7 = vcmp.gt.f32.partialorder %v1219_v40, 0.0 }
 0x37c   :  { %1450 = vperm.xlu1 %1749, %v1304_v47   ;;  %v1355_v23 = vpop.permute.xlu1 %1354  ;;  %v1297_v39 = vadd.f32 %v1279_v59, %v1249_v43 }
 0x37d   :  { %1416 = vst [vmem:[#allocation6 + $0x20] sm:$0xff] %v1355_v23  ;;  %v1360_v19 = vpop.permute.xlu0 %1359 }
 0x37e   :  { %v1903_v29 = vpop.eup %1902  ;;  %1417 = vst [vmem:[#allocation6 + $0x28] sm:$0xff] %v1360_v19  ;;  %v1313_v10 = vsel %vm1233_vm15, %v1297_v39, -1e+30 }
 0x37f   :  { %1495 = vperm.xlu0 %1748, %v1313_v10   ;;  %v1265_v2 = vmul.f32 0.6931472, %v1903_v29 }
 0x380   :  { %1490 = vperm.xlu1 %1749, %v1312_v37   ;;  %v1365_v27 = vpop.permute.xlu1 %1364 }
 0x381   :  { %v1905_v14 = vpop.eup %1904  ;;  %1418 = vst [vmem:[#allocation6 + $0x30] sm:$0xff] %v1365_v27  ;;  %v1370_v6 = vpop.permute.xlu0 %1369  ;;  %v1290_v13 = vadd.f32 %v1265_v2, %v1242_v63 }
 0x382   :  { %v1907_v31 = vpop.eup %1906  ;;  %1419 = vst [vmem:[#allocation6 + $0x38] sm:$0xff] %v1370_v6  ;;  %v1267_v45 = vmul.f32 0.6931472, %v1905_v14 }
 0x383   :  { %v1306_v18 = vsel %vm1226_vm2, %v1290_v13, -1e+30  ;;  %v1281_v50 = vmul.f32 0.6931472, %v1907_v31 }
 0x384   :  { %v1375_v25 = vpop.permute.xlu1 %1374  ;;  %1460 = vperm.xlu1 %1749, %v1306_v18   ;;  %v1291_v57 = vadd.f32 %v1267_v45, %v1243_v26 }
 0x385   :  { %v1909_v30 = vpop.eup %1908  ;;  %1420 = vst [vmem:[#allocation6 + $0x40] sm:$0xff] %v1375_v25  ;;  %v1380_v62 = vpop.permute.xlu0 %1379  ;;  %v1298_v24 = vadd.f32 %v1281_v50, %v1250_v33 }
 0x386   :  { %1421 = vst [vmem:[#allocation6 + $0x48] sm:$0xff] %v1380_v62  ;;  %v1307_v49 = vsel %vm1227_vm3, %v1291_v57, -1e+30  ;;  %v1283_v3 = vmul.f32 0.6931472, %v1909_v30 }
 0x387   :  { %1465 = vperm.xlu0 %1748, %v1307_v49   ;;  %v1314_v60 = vsel %vm1234_vm0, %v1298_v24, -1e+30 }
 0x388   :  { %v1385_v21 = vpop.permute.xlu1 %1384  ;;  %1500 = vperm.xlu1 %1749, %v1314_v60   ;;  %v1299_v44 = vadd.f32 %v1283_v3, %v1251_v46 }
 0x389   :  { %1422 = vst [vmem:[#allocation6 + $0x50] sm:$0xff] %v1385_v21  ;;  %v1390_v55 = vpop.permute.xlu0 %1389 }
 0x38a   :  { %1423 = vst [vmem:[#allocation6 + $0x58] sm:$0xff] %v1390_v55  ;;  %v1315_v53 = vsel %vm1235_vm7, %v1299_v44, -1e+30 }
 0x38b   :  { %1505 = vperm.xlu0 %1748, %v1315_v53  }
 0x38c   :  { %v1395_v58 = vpop.permute.xlu1 %1394 }
 0x38d   :  { %1424 = vst [vmem:[#allocation6 + $0x60] sm:$0xff] %v1395_v58  ;;  %v1400_v17 = vpop.permute.xlu0 %1399 }
 0x38e   :  { %1425 = vst [vmem:[#allocation6 + $0x68] sm:$0xff] %v1400_v17 }
 0x390   :  { %v1405_v36 = vpop.permute.xlu1 %1404 }
 0x391   :  { %1426 = vst [vmem:[#allocation6 + $0x70] sm:$0xff] %v1405_v36  ;;  %v1410_v16 = vpop.permute.xlu0 %1409 }
 0x392   :  { %1427 = vst [vmem:[#allocation6 + $0x78] sm:$0xff] %v1410_v16 }
 0x393   :  { %1921 = shalt.err (!%p1918_p4)
}
 0x394   :  { %s1922_s7 = scalar_lea.hbm %s3096_s3, 2048 }
 0x395   :  { %p1923_p5 = scmp.ne.s32.totalorder %s3096_s3, %s1922_s7  ;;  %p1926_p6 = scmp.lt.u32.totalorder %s1922_s7, %s3096_s3 }
 0x397   :  { %p1928_p7 = pnand %p1926_p6, %p1923_p5 }
 0x399   :  { %1931 = shalt.err (!%p1928_p7)
}
 0x39a   :  { %s1963_s11 = smov 128   ;;  %s1964_s12 = smov 8  }
 0x39b   :  { %1535 = dma.vmem_to_hbm [thread:$0]  %s1530_s29, 2048, %s3096_s3, [#allocation7], %s1963_s11, %s1963_s11, %s1964_s12  }
 0x39c   :  { %s1965_s3 = smov [#allocation8]  }
 0x39d   :  { %s1541_s15 = sshll.u32 %s1965_s3, 4  ;;  %s1542_s15 = int_to_ptr.vmem [resolvable:$true] %s1541_s15 }
 0x39e   :  { %s1932_s16 = scalar_lea.vmem %s1542_s15, 2048  ;;  %p1937_p9 = scmp.lt.s32.totalorder %s1542_s15, %s1542_s15 }
 0x39f   :  { %p1933_p8 = scmp.ne.s32.totalorder %s1542_s15, %s1932_s16  ;;  %p1938_p10 = scmp.lt.s32.totalorder %s1932_s16, %s1932_s16 }
 0x3a1   :  { %p1939_p11 = por %p1938_p10, %p1937_p9 }
 0x3a3   :  { %p1940_p12 = pnand %p1939_p11, %p1933_p8 }
 0x3e2   :  { %v1436_v35 = vpop.permute.xlu0 %1435 }
 0x3e3   :  { %1509 = vst [vmem:[#allocation8 + $0x8] sm:$0xff] %v1436_v35 }
 0x3e7   :  { %v1476_v12 = vpop.permute.xlu0 %1475 }
 0x3e8   :  { %1517 = vst [vmem:[#allocation8 + $0x48] sm:$0xff] %v1476_v12 }
 0x3eb   :  { %v1431_v56 = vpop.permute.xlu1 %1430 }
 0x3ec   :  { %1508 = vst [vmem:[#allocation8] sm:$0xff] %v1431_v56 }
 0x3ef   :  { %v1471_v54 = vpop.permute.xlu1 %1470  ;;  %v1446_v1 = vpop.permute.xlu0 %1445 }
 0x3f0   :  { %1516 = vst [vmem:[#allocation8 + $0x40] sm:$0xff] %v1471_v54  ;;  %1511 = vst [vmem:[#allocation8 + $0x18] sm:$0xff] %v1446_v1 }
 0x3f3   :  { %v1441_v28 = vpop.permute.xlu1 %1440  ;;  %v1486_v9 = vpop.permute.xlu0 %1485 }
 0x3f4   :  { %1510 = vst [vmem:[#allocation8 + $0x10] sm:$0xff] %v1441_v28  ;;  %1519 = vst [vmem:[#allocation8 + $0x58] sm:$0xff] %v1486_v9 }
 0x3f7   :  { %v1481_v20 = vpop.permute.xlu1 %1480 }
 0x3f8   :  { %1518 = vst [vmem:[#allocation8 + $0x50] sm:$0xff] %v1481_v20 }
 0x3fa   :  { %v1456_v42 = vpop.permute.xlu0 %1455 }
 0x3fb   :  { %v1451_v34 = vpop.permute.xlu1 %1450  ;;  %1513 = vst [vmem:[#allocation8 + $0x28] sm:$0xff] %v1456_v42 }
 0x3fc   :  { %1512 = vst [vmem:[#allocation8 + $0x20] sm:$0xff] %v1451_v34 }
 0x3fe   :  { %v1496_v61 = vpop.permute.xlu0 %1495 }
 0x3ff   :  { %v1491_v0 = vpop.permute.xlu1 %1490  ;;  %1521 = vst [vmem:[#allocation8 + $0x68] sm:$0xff] %v1496_v61 }
 0x400   :  { %1520 = vst [vmem:[#allocation8 + $0x60] sm:$0xff] %v1491_v0 }
 0x403   :  { %v1461_v5 = vpop.permute.xlu1 %1460 }
 0x404   :  { %1514 = vst [vmem:[#allocation8 + $0x30] sm:$0xff] %v1461_v5 }
 0x406   :  { %v1466_v7 = vpop.permute.xlu0 %1465 }
 0x407   :  { %1515 = vst [vmem:[#allocation8 + $0x38] sm:$0xff] %v1466_v7  ;;  %v1501_v11 = vpop.permute.xlu1 %1500 }
 0x408   :  { %1522 = vst [vmem:[#allocation8 + $0x70] sm:$0xff] %v1501_v11 }
 0x40a   :  { %v1506_v51 = vpop.permute.xlu0 %1505 }
 0x40b   :  { %1523 = vst [vmem:[#allocation8 + $0x78] sm:$0xff] %v1506_v51 }
 0x40c   :  { %1943 = shalt.err (!%p1940_p12)
}
 0x40d   :  { %s1944_s19 = scalar_lea.hbm %s3097_s4, 2048 }
 0x40e   :  { %p1945_p13 = scmp.ne.s32.totalorder %s3097_s4, %s1944_s19  ;;  %p1948_p0 = scmp.lt.u32.totalorder %s1944_s19, %s3097_s4 }
 0x410   :  { %p1950_p1 = pnand %p1948_p0, %p1945_p13 }
 0x412   :  { %1953 = shalt.err (!%p1950_p1)
}
 0x413   :  { %1547 = dma.vmem_to_hbm [thread:$0]  %s1542_s15, 2048, %s3097_s4, [#allocation9], %s1963_s11, %s1963_s11, %s1964_s12  }
 0x414   :  { %1954 = dma.done.wait [#allocation7], 2048  }
 0x415   :  { %1955 = vsyncadd [#allocation7], 4294965248 }
 0x416   :  { %1956 = dma.done.wait [#allocation9], 2048  }
 0x417   :  { %1957 = vsyncadd [#allocation9], 4294965248 }
 0x418   :  { %1554 = vsyncpa [#allocation7], 1 }
 0x419   :  { %1555 = vsyncpa [#allocation9], 1 }

</bundles_post_ra>
